<compile_context>
chip_gen: v7x
topology: tpu7x:2x2x1
jax: 0.10.0
libtpu: 0.0.40
codegen_flags: <defaults>
</compile_context>

<pallas_src>
import functools
import math

import jax
import jax.numpy as jnp
from jax.experimental import pallas as pl
from jax.experimental.pallas import tpu as pltpu


# Row indices inside the packed per-layer vector slab (biases + LayerNorm params).
_SELF_BQKV, _SELF_BO = 0, 1
_CROSS_BQ, _CROSS_BKV, _CROSS_BO = 2, 3, 4
_B1, _B2 = 5, 6
_LN1_G, _LN1_B, _LN2_G, _LN2_B, _LN3_G, _LN3_B = 7, 8, 9, 10, 11, 12
_N_VEC_ROWS = 13


# ----------------------------- fused decoder-stack kernel --------------------

def _decoder_stack_kernel(
        x_ref, enc_ref, omask_ref, imask_ref,
        s_wqkv_ref, s_wo_ref, c_wq_ref, c_wkv_ref, c_wo_ref, w1_ref, w2_ref,
        vec_ref,
        o_ref,
        xs_ref,
        *, n_heads, eps):
    layer = pl.program_id(1)
    n_layers = pl.num_programs(1)

    bt, s, d = x_ref.shape
    sk = enc_ref.shape[1]
    nh = n_heads
    dh = d // nh
    f = w1_ref.shape[-1]
    scale = 1.0 / math.sqrt(dh)

    # Layer 0 loads the (embedded) input slab; later layers consume the
    # VMEM-resident activations written by the previous grid step.
    @pl.when(layer == 0)
    def _():
        xs_ref[...] = x_ref[...]

    x2 = xs_ref[...].reshape(bt * s, d)        # [M, D]  (batch folded into M)
    enc2 = enc_ref[...].reshape(bt * sk, d)    # [Mk, D]
    vec = vec_ref[0]                           # [N_VEC_ROWS, Wmax] f32

    def row(r, width):                         # [1, width] bias / LN vector
        return vec[r:r + 1, :width]

    def mm(a, w_ref):
        # bf16 x bf16 -> f32 on the MXU (weights already stored as bf16 in HBM).
        return jnp.dot(a.astype(jnp.bfloat16), w_ref[0],
                       preferred_element_type=jnp.float32)

    def layernorm(h, g_row, b_row):
        mean = jnp.mean(h, axis=-1, keepdims=True)
        var = jnp.mean((h - mean) ** 2, axis=-1, keepdims=True)   # biased var
        return (h - mean) * jax.lax.rsqrt(var + eps) * row(g_row, d) + row(b_row, d)

    def split_heads(t, rows):
        # [bt*rows, D] -> [nh*bt, rows, dh] (head-major batch for batched dots).
        t = t.astype(jnp.bfloat16)
        return jnp.concatenate(
            [t[:, h * dh:(h + 1) * dh].reshape(bt, rows, dh) for h in range(nh)],
            axis=0)

    def attention(qh, kh, vh, mask_i8, skk):
        # Head-batched scores / PV: one batched dot_general each.
        sc = jnp.einsum('bqd,bkd->bqk', qh, kh,
                        preferred_element_type=jnp.float32) * scale  # [nh*bt,s,skk]
        sc = sc.reshape(nh, bt, s, skk)
        maskf = jnp.broadcast_to(mask_i8.astype(jnp.float32)[None], sc.shape)
        sc = jnp.where(maskf > 0.0, sc, jnp.float32(-1e9))
        sc = sc - jnp.max(sc, axis=-1, keepdims=True)
        p = jnp.exp(sc)
        p = p * pl.reciprocal(jnp.sum(p, axis=-1, keepdims=True), approx=True)
        p = p.reshape(nh * bt, s, skk).astype(jnp.bfloat16)
        out = jnp.einsum('bqk,bkd->bqd', p, vh,
                         preferred_element_type=jnp.float32)         # [nh*bt,s,dh]
        out = out.reshape(nh, bt * s, dh)
        # merge heads back onto the lane axis -> [M, D]
        return jnp.concatenate([out[h] for h in range(nh)], axis=-1)

    # ---- self-attention (fused QKV projection) + residual + LN1 ----
    qkv = mm(x2, s_wqkv_ref) + row(_SELF_BQKV, 3 * d)                # [M, 3D]
    att = attention(split_heads(qkv[:, :d], s),
                    split_heads(qkv[:, d:2 * d], s),
                    split_heads(qkv[:, 2 * d:], s),
                    omask_ref[...], s)
    att = mm(att, s_wo_ref) + row(_SELF_BO, d)
    x2 = layernorm(att + x2, _LN1_G, _LN1_B)

    # ---- cross-attention (fused KV projection) + residual + LN2 ----
    q = mm(x2, c_wq_ref) + row(_CROSS_BQ, d)                         # [M, D]
    kv = mm(enc2, c_wkv_ref) + row(_CROSS_BKV, 2 * d)                # [Mk, 2D]
    att = attention(split_heads(q, s),
                    split_heads(kv[:, :d], sk),
                    split_heads(kv[:, d:], sk),
                    imask_ref[...], sk)
    att = mm(att, c_wo_ref) + row(_CROSS_BO, d)
    x2 = layernorm(att + x2, _LN2_G, _LN2_B)

    # ---- FFN + residual + LN3 ----
    hid = jnp.maximum(mm(x2, w1_ref) + row(_B1, f), 0.0)             # ReLU (f32)
    ffn = mm(hid, w2_ref) + row(_B2, d)
    x2 = layernorm(ffn + x2, _LN3_G, _LN3_B)

    # carry activations in VMEM across the layer grid axis
    xs_ref[...] = x2.reshape(bt, s, d)

    @pl.when(layer == n_layers - 1)
    def _():
        o_ref[...] = x2.reshape(bt, s, d).astype(o_ref.dtype)


# ----------------------------- wrapper ----------------------------------------

def decoder_stack(x, enc, input_mask, output_mask, stacked, *, n_heads, eps,
                  batch_tile=None):
    b, s, d = x.shape
    sk = enc.shape[1]
    n_layers = stacked["self_wqkv"].shape[0]
    f = stacked["w1"].shape[-1]

    bt = b if batch_tile is None else batch_tile
    assert b % bt == 0
    n_bt = b // bt

    # masks shipped as int8 (same 0/1 semantics, 4x less DMA than f32)
    omask = (output_mask.reshape(b, s, s) != 0).astype(jnp.int8)
    imask = (input_mask.reshape(b, s, sk) != 0).astype(jnp.int8)

    weights = [stacked["self_wqkv"], stacked["self_wo"],
               stacked["cross_wq"], stacked["cross_wkv"], stacked["cross_wo"],
               stacked["w1"], stacked["w2"]]
    vecs = stacked["vec"]

    def wspec(arr):  # one layer's slice per grid step (prefetch over layer axis)
        return pl.BlockSpec((1,) + arr.shape[1:], lambda i, l: (l, 0, 0))

    in_specs = [
        pl.BlockSpec((bt, s, d), lambda i, l: (i, 0, 0)),    # x (activations)
        pl.BlockSpec((bt, sk, d), lambda i, l: (i, 0, 0)),   # encoder out
        pl.BlockSpec((bt, s, s), lambda i, l: (i, 0, 0)),    # self-attn mask
        pl.BlockSpec((bt, s, sk), lambda i, l: (i, 0, 0)),   # cross-attn mask
    ] + [wspec(w) for w in weights] + [wspec(vecs)]

    # rough cost estimate for XLA's scheduler
    flops = 2 * n_layers * b * (
        s * d * 3 * d          # self QKV
        + 2 * s * s * d        # self scores + PV
        + s * d * d            # self out proj
        + s * d * d            # cross Q
        + sk * d * 2 * d       # cross KV
        + 2 * s * sk * d       # cross scores + PV
        + s * d * d            # cross out proj
        + 2 * s * d * f)       # FFN
    transcendentals = n_layers * b * (n_heads * s * (s + sk) + 8 * s)
    bytes_accessed = (x.size * 4 + enc.size * 4 + omask.size + imask.size
                      + sum(w.size * 2 for w in weights) + vecs.size * 4
                      + b * s * d * 4)

    return pl.pallas_call(
        functools.partial(_decoder_stack_kernel, n_heads=n_heads, eps=eps),
        grid=(n_bt, n_layers),
        in_specs=in_specs,
        out_specs=pl.BlockSpec((bt, s, d), lambda i, l: (i, 0, 0)),
        out_shape=jax.ShapeDtypeStruct((b, s, d), jnp.float32),
        scratch_shapes=[pltpu.VMEM((bt, s, d), jnp.float32)],  # resident activations
        compiler_params=pltpu.CompilerParams(
            dimension_semantics=("parallel", "arbitrary")),
        cost_estimate=pl.CostEstimate(
            flops=int(flops), transcendentals=int(transcendentals),
            bytes_accessed=int(bytes_accessed)),
    )(x, enc, omask, imask, *weights, vecs)


# ----------------------------- model glue (plain JAX, jitted) ----------------

def positional_encoding(seq_len, d):
    pos = jnp.arange(seq_len, dtype=jnp.float32)[:, None]
    i = jnp.arange(0, d, 2, dtype=jnp.float32)
    angle = pos / jnp.power(10000.0, i / d)
    pe = jnp.zeros((seq_len, d), jnp.float32)
    pe = pe.at[:, 0::2].set(jnp.sin(angle))
    pe = pe.at[:, 1::2].set(jnp.cos(angle))
    return pe


@functools.partial(jax.jit, static_argnames=("n_heads", "eps"))
def decoder_forward(params, tokens, encoder_out, input_mask, output_mask,
                    *, n_heads, eps):
    d = params["embed"].shape[1]
    # embedding lookup (gather is glue, not in-kernel) + sqrt(D) scale + PE
    x = params["embed"][tokens] * math.sqrt(d)
    x = x + params["pe"][None, : tokens.shape[1]]
    # pe_dropout / attn_dropout / ffn_dropout: eval-mode identity
    return decoder_stack(x, encoder_out, input_mask, output_mask,
                         params["stacked"], n_heads=n_heads, eps=eps)


# ----------------------------- deterministic params --------------------------

def init_params(key, vocab_size, embed_dim, ffn_dim, n_layers, seq_len):
    d, f = embed_dim, ffn_dim
    keys = iter(jax.random.split(key, 1 + n_layers * 10))

    def draw(shape):
        return jax.random.normal(next(keys), shape, jnp.float32) * 0.02

    embed = draw((vocab_size, d))

    wmax = max(3 * d, 2 * d, f)
    s_wqkv_l, s_wo_l, c_wq_l, c_wkv_l, c_wo_l, w1_l, w2_l, vec_l = \
        [], [], [], [], [], [], [], []

    def padrow(v):
        return jnp.pad(v, (0, wmax - v.shape[0]))

    for _ in range(n_layers):
        # self-attention (QKV fused)
        wq, wk, wv, wo = (draw((d, d)) for _ in range(4))
        s_wqkv_l.append(jnp.concatenate([wq, wk, wv], axis=1))
        s_wo_l.append(wo)
        # cross-attention (KV fused)
        wq, wk, wv, wo = (draw((d, d)) for _ in range(4))
        c_wq_l.append(wq)
        c_wkv_l.append(jnp.concatenate([wk, wv], axis=1))
        c_wo_l.append(wo)
        # FFN
        w1_l.append(draw((d, f)))
        w2_l.append(draw((f, d)))
        # packed biases + LayerNorm params (f32 slab)
        rows = [
            jnp.zeros(3 * d), jnp.zeros(d),                 # self bqkv, bo
            jnp.zeros(d), jnp.zeros(2 * d), jnp.zeros(d),   # cross bq, bkv, bo
            jnp.zeros(f), jnp.zeros(d),                     # ffn b1, b2
            jnp.ones(d), jnp.zeros(d),                      # ln1 g, b
            jnp.ones(d), jnp.zeros(d),                      # ln2 g, b
            jnp.ones(d), jnp.zeros(d),                      # ln3 g, b
        ]
        assert len(rows) == _N_VEC_ROWS
        vec_l.append(jnp.stack([padrow(r) for r in rows]))

    stacked = {
        # weights live in HBM as bf16 (half the DMA bytes / resident VMEM)
        "self_wqkv": jnp.stack(s_wqkv_l).astype(jnp.bfloat16),
        "self_wo": jnp.stack(s_wo_l).astype(jnp.bfloat16),
        "cross_wq": jnp.stack(c_wq_l).astype(jnp.bfloat16),
        "cross_wkv": jnp.stack(c_wkv_l).astype(jnp.bfloat16),
        "cross_wo": jnp.stack(c_wo_l).astype(jnp.bfloat16),
        "w1": jnp.stack(w1_l).astype(jnp.bfloat16),
        "w2": jnp.stack(w2_l).astype(jnp.bfloat16),
        "vec": jnp.stack(vec_l).astype(jnp.float32),
    }
    return {"embed": embed, "pe": positional_encoding(seq_len, d),
            "stacked": stacked}


# ----------------------------- main -------------------------------------------

if __name__ == "__main__":
    vocab_size = 50
    embed_dim = 32    # TODO(synk): at real sizes make embed_dim/ffn_dim multiples
    seq_len = 8       #             of 128 for lane-dense stores / full MXU K fill.
    enc_seq = 8
    n_heads = 4
    ffn_dim = 64
    n_layers = 2
    eps = 1e-6
    B = 2

    key = jax.random.PRNGKey(0)
    pkey, tkey, ekey = jax.random.split(key, 3)

    params = init_params(pkey, vocab_size, embed_dim, ffn_dim, n_layers, seq_len)
    tokens = jax.random.randint(tkey, (B, seq_len), 0, vocab_size)
    encoder_out = jax.random.normal(ekey, (B, enc_seq, embed_dim), jnp.float32)

    # output_mask: causal mask for decoder self-attention (1 = attend)
    causal = jnp.tril(jnp.ones((seq_len, seq_len), jnp.float32))
    output_mask = jnp.broadcast_to(causal, (B, 1, seq_len, seq_len))
    # input_mask: encoder padding mask for cross-attention (no padding here)
    input_mask = jnp.ones((B, 1, seq_len, enc_seq), jnp.float32)

    out = decoder_forward(params, tokens, encoder_out, input_mask, output_mask,
                          n_heads=n_heads, eps=eps)
    jax.block_until_ready(out)
    assert out.shape == (B, seq_len, embed_dim)
    assert bool(jnp.all(jnp.isfinite(out)))
    print("KERNEL_OK")
</pallas_src>

<mosaic_0001>
module attributes {stable_mosaic.version = 11 : i64} {
  func.func @_decoder_stack_kernel(%arg0: i32, %arg1: i32, %arg2: memref<2x8x32xf32, #tpu.memory_space<vmem>>, %arg3: memref<2x8x32xf32, #tpu.memory_space<vmem>>, %arg4: memref<2x8x8xi8, #tpu.memory_space<vmem>>, %arg5: memref<2x8x8xi8, #tpu.memory_space<vmem>>, %arg6: memref<1x32x96xbf16, #tpu.memory_space<vmem>>, %arg7: memref<1x32x32xbf16, #tpu.memory_space<vmem>>, %arg8: memref<1x32x32xbf16, #tpu.memory_space<vmem>>, %arg9: memref<1x32x64xbf16, #tpu.memory_space<vmem>>, %arg10: memref<1x32x32xbf16, #tpu.memory_space<vmem>>, %arg11: memref<1x32x64xbf16, #tpu.memory_space<vmem>>, %arg12: memref<1x64x32xbf16, #tpu.memory_space<vmem>>, %arg13: memref<1x13x96xf32, #tpu.memory_space<vmem>>, %arg14: memref<2x8x32xf32, #tpu.memory_space<vmem>>, %arg15: memref<2x8x32xf32, #tpu.memory_space<vmem>>) attributes {dimension_semantics = [#tpu.dimension_semantics<parallel>, #tpu.dimension_semantics<arbitrary>], iteration_bounds = array<i64: 1, 2>, scalar_prefetch = 0 : i64, scratch_operands = 1 : i64, tpu.core_type = #tpu.core_type<tc>, window_params = [{transform_indices = @transform_0, window_bounds = array<i64: 2, 8, 32>}, {transform_indices = @transform_1, window_bounds = array<i64: 2, 8, 32>}, {transform_indices = @transform_2, window_bounds = array<i64: 2, 8, 8>}, {transform_indices = @transform_3, window_bounds = array<i64: 2, 8, 8>}, {transform_indices = @transform_4, window_bounds = array<i64: 1, 32, 96>}, {transform_indices = @transform_5, window_bounds = array<i64: 1, 32, 32>}, {transform_indices = @transform_6, window_bounds = array<i64: 1, 32, 32>}, {transform_indices = @transform_7, window_bounds = array<i64: 1, 32, 64>}, {transform_indices = @transform_8, window_bounds = array<i64: 1, 32, 32>}, {transform_indices = @transform_9, window_bounds = array<i64: 1, 32, 64>}, {transform_indices = @transform_10, window_bounds = array<i64: 1, 64, 32>}, {transform_indices = @transform_11, window_bounds = array<i64: 1, 13, 96>}, {transform_indices = @transform_12, window_bounds = array<i64: 2, 8, 32>}]} {
    %c0_i32 = arith.constant 0 : i32
    %0 = arith.cmpi eq, %arg1, %c0_i32 : i32
    %1 = arith.extui %0 : i1 to i32
    %c0_i32_0 = arith.constant 0 : i32
    %2 = arith.cmpi ne, %1, %c0_i32_0 : i32
    scf.if %2 {
      %c0_76 = arith.constant 0 : index
      %c0_77 = arith.constant 0 : index
      %c0_78 = arith.constant 0 : index
      %277 = vector.load %arg2[%c0_76, %c0_77, %c0_78] : memref<2x8x32xf32, #tpu.memory_space<vmem>>, vector<2x8x32xf32>
      %c0_79 = arith.constant 0 : index
      %c0_80 = arith.constant 0 : index
      %c0_81 = arith.constant 0 : index
      %278 = vector.load %arg15[%c0_79, %c0_80, %c0_81] : memref<2x8x32xf32, #tpu.memory_space<vmem>>, vector<2x8x32xf32>
      tpu.vector_store %arg15[%c0_79, %c0_80, %c0_81], %277 {strides = array<i32>} : memref<2x8x32xf32, #tpu.memory_space<vmem>>, vector<2x8x32xf32>,
    } else {
    }
    %c0 = arith.constant 0 : index
    %c0_1 = arith.constant 0 : index
    %c0_2 = arith.constant 0 : index
    %3 = vector.load %arg15[%c0, %c0_1, %c0_2] : memref<2x8x32xf32, #tpu.memory_space<vmem>>, vector<2x8x32xf32>
    %4 = vector.shape_cast %3 : vector<2x8x32xf32> to vector<16x32xf32>
    %c0_3 = arith.constant 0 : index
    %c0_4 = arith.constant 0 : index
    %c0_5 = arith.constant 0 : index
    %5 = vector.load %arg3[%c0_3, %c0_4, %c0_5] : memref<2x8x32xf32, #tpu.memory_space<vmem>>, vector<2x8x32xf32>
    %6 = vector.shape_cast %5 : vector<2x8x32xf32> to vector<16x32xf32>
    %c0_6 = arith.constant 0 : index
    %c0_7 = arith.constant 0 : index
    %c0_8 = arith.constant 0 : index
    %7 = vector.load %arg13[%c0_6, %c0_7, %c0_8] : memref<1x13x96xf32, #tpu.memory_space<vmem>>, vector<1x13x96xf32>
    %8 = vector.shape_cast %7 : vector<1x13x96xf32> to vector<13x96xf32>
    %9 = arith.truncf %4 : vector<16x32xf32> to vector<16x32xbf16>
    %c0_9 = arith.constant 0 : index
    %c0_10 = arith.constant 0 : index
    %c0_11 = arith.constant 0 : index
    %10 = vector.load %arg6[%c0_9, %c0_10, %c0_11] : memref<1x32x96xbf16, #tpu.memory_space<vmem>>, vector<1x32x96xbf16>
    %11 = vector.shape_cast %10 : vector<1x32x96xbf16> to vector<32x96xbf16>
    %cst = arith.constant dense<0.000000e+00> : vector<16x96xf32>
    %12 = tpu.matmul %9, %11, %cst {dimension_numbers = #tpu.dot_dimension_numbers<[1], [0], [0], [1], [0, 0, 1, 1], [], []>} : vector<16x32xbf16>, vector<32x96xbf16>, vector<16x96xf32> -> vector<16x96xf32>
    %13 = vector.extract_strided_slice %8 {offsets = [0, 0], sizes = [1, 96], strides = [1, 1]} : vector<13x96xf32> to vector<1x96xf32>
    %14 = vector.broadcast %13 : vector<1x96xf32> to vector<16x96xf32>
    %15 = arith.addf %12, %14 : vector<16x96xf32>
    %16 = vector.extract_strided_slice %15 {offsets = [0, 0], sizes = [16, 32], strides = [1, 1]} : vector<16x96xf32> to vector<16x32xf32>
    %17 = arith.truncf %16 : vector<16x32xf32> to vector<16x32xbf16>
    %18 = vector.extract_strided_slice %17 {offsets = [0, 0], sizes = [16, 8], strides = [1, 1]} : vector<16x32xbf16> to vector<16x8xbf16>
    %19 = vector.shape_cast %18 : vector<16x8xbf16> to vector<2x8x8xbf16>
    %20 = vector.extract_strided_slice %17 {offsets = [0, 8], sizes = [16, 8], strides = [1, 1]} : vector<16x32xbf16> to vector<16x8xbf16>
    %21 = vector.shape_cast %20 : vector<16x8xbf16> to vector<2x8x8xbf16>
    %22 = vector.extract_strided_slice %17 {offsets = [0, 16], sizes = [16, 8], strides = [1, 1]} : vector<16x32xbf16> to vector<16x8xbf16>
    %23 = vector.shape_cast %22 : vector<16x8xbf16> to vector<2x8x8xbf16>
    %24 = vector.extract_strided_slice %17 {offsets = [0, 24], sizes = [16, 8], strides = [1, 1]} : vector<16x32xbf16> to vector<16x8xbf16>
    %25 = vector.shape_cast %24 : vector<16x8xbf16> to vector<2x8x8xbf16>
    %26 = tpu.concatenate %19, %21, %23, %25 in 0 : vector<2x8x8xbf16>, vector<2x8x8xbf16>, vector<2x8x8xbf16>, vector<2x8x8xbf16> -> vector<8x8x8xbf16>
    %27 = vector.extract_strided_slice %15 {offsets = [0, 32], sizes = [16, 32], strides = [1, 1]} : vector<16x96xf32> to vector<16x32xf32>
    %28 = arith.truncf %27 : vector<16x32xf32> to vector<16x32xbf16>
    %29 = vector.extract_strided_slice %28 {offsets = [0, 0], sizes = [16, 8], strides = [1, 1]} : vector<16x32xbf16> to vector<16x8xbf16>
    %30 = vector.shape_cast %29 : vector<16x8xbf16> to vector<2x8x8xbf16>
    %31 = vector.extract_strided_slice %28 {offsets = [0, 8], sizes = [16, 8], strides = [1, 1]} : vector<16x32xbf16> to vector<16x8xbf16>
    %32 = vector.shape_cast %31 : vector<16x8xbf16> to vector<2x8x8xbf16>
    %33 = vector.extract_strided_slice %28 {offsets = [0, 16], sizes = [16, 8], strides = [1, 1]} : vector<16x32xbf16> to vector<16x8xbf16>
    %34 = vector.shape_cast %33 : vector<16x8xbf16> to vector<2x8x8xbf16>
    %35 = vector.extract_strided_slice %28 {offsets = [0, 24], sizes = [16, 8], strides = [1, 1]} : vector<16x32xbf16> to vector<16x8xbf16>
    %36 = vector.shape_cast %35 : vector<16x8xbf16> to vector<2x8x8xbf16>
    %37 = tpu.concatenate %30, %32, %34, %36 in 0 : vector<2x8x8xbf16>, vector<2x8x8xbf16>, vector<2x8x8xbf16>, vector<2x8x8xbf16> -> vector<8x8x8xbf16>
    %38 = vector.extract_strided_slice %15 {offsets = [0, 64], sizes = [16, 32], strides = [1, 1]} : vector<16x96xf32> to vector<16x32xf32>
    %39 = arith.truncf %38 : vector<16x32xf32> to vector<16x32xbf16>
    %40 = vector.extract_strided_slice %39 {offsets = [0, 0], sizes = [16, 8], strides = [1, 1]} : vector<16x32xbf16> to vector<16x8xbf16>
    %41 = vector.shape_cast %40 : vector<16x8xbf16> to vector<2x8x8xbf16>
    %42 = vector.extract_strided_slice %39 {offsets = [0, 8], sizes = [16, 8], strides = [1, 1]} : vector<16x32xbf16> to vector<16x8xbf16>
    %43 = vector.shape_cast %42 : vector<16x8xbf16> to vector<2x8x8xbf16>
    %44 = vector.extract_strided_slice %39 {offsets = [0, 16], sizes = [16, 8], strides = [1, 1]} : vector<16x32xbf16> to vector<16x8xbf16>
    %45 = vector.shape_cast %44 : vector<16x8xbf16> to vector<2x8x8xbf16>
    %46 = vector.extract_strided_slice %39 {offsets = [0, 24], sizes = [16, 8], strides = [1, 1]} : vector<16x32xbf16> to vector<16x8xbf16>
    %47 = vector.shape_cast %46 : vector<16x8xbf16> to vector<2x8x8xbf16>
    %48 = tpu.concatenate %41, %43, %45, %47 in 0 : vector<2x8x8xbf16>, vector<2x8x8xbf16>, vector<2x8x8xbf16>, vector<2x8x8xbf16> -> vector<8x8x8xbf16>
    %c0_12 = arith.constant 0 : index
    %c0_13 = arith.constant 0 : index
    %c0_14 = arith.constant 0 : index
    %49 = vector.load %arg4[%c0_12, %c0_13, %c0_14] : memref<2x8x8xi8, #tpu.memory_space<vmem>>, vector<2x8x8xi8>
    "tpu.trace_start"() <{level = 10 : i32, message = "bqd,bkd->bqk"}> : () -> ()
    %cst_15 = arith.constant dense<0.000000e+00> : vector<8x8x8xf32>
    %50 = tpu.matmul %26, %37, %cst_15 {dimension_numbers = #tpu.dot_dimension_numbers<[2], [2], [1], [1], [0, 0, 0, 1, 1, 1], [0], [0]>} : vector<8x8x8xbf16>, vector<8x8x8xbf16>, vector<8x8x8xf32> -> vector<8x8x8xf32>
    "tpu.trace_stop"() : () -> ()
    %cst_16 = arith.constant 0.353553385 : f32
    %51 = vector.broadcast %cst_16 : f32 to vector<8x8x8xf32>
    %52 = arith.mulf %50, %51 : vector<8x8x8xf32>
    %53 = vector.shape_cast %52 : vector<8x8x8xf32> to vector<4x2x8x8xf32>
    %54 = arith.sitofp %49 : vector<2x8x8xi8> to vector<2x8x8xf32>
    %55 = vector.shape_cast %54 : vector<2x8x8xf32> to vector<1x2x8x8xf32>
    %56 = vector.shape_cast %55 : vector<1x2x8x8xf32> to vector<1x2x8x8xf32>
    %57 = vector.broadcast %56 : vector<1x2x8x8xf32> to vector<4x2x8x8xf32>
    %cst_17 = arith.constant 0.000000e+00 : f32
    %58 = vector.broadcast %cst_17 : f32 to vector<4x2x8x8xf32>
    %59 = arith.cmpf ogt, %57, %58 : vector<4x2x8x8xf32>
    %cst_18 = arith.constant -1.000000e+09 : f32
    %60 = vector.broadcast %cst_18 : f32 to vector<4x2x8x8xf32>
    %61 = arith.select %59, %53, %60 : vector<4x2x8x8xi1>, vector<4x2x8x8xf32>
    %cst_19 = arith.constant dense<0xFF800000> : vector<4x2x8xf32>
    %62 = vector.multi_reduction <maximumf>, %61, %cst_19 [3] : vector<4x2x8x8xf32> to vector<4x2x8xf32>
    %63 = vector.shape_cast %62 : vector<4x2x8xf32> to vector<4x2x8x1xf32>
    %64 = vector.broadcast %63 : vector<4x2x8x1xf32> to vector<4x2x8x8xf32>
    %65 = arith.subf %61, %64 : vector<4x2x8x8xf32>
    %66 = math.exp %65 : vector<4x2x8x8xf32>
    %cst_20 = arith.constant dense<0.000000e+00> : vector<4x2x8xf32>
    %67 = vector.multi_reduction <add>, %66, %cst_20 [3] : vector<4x2x8x8xf32> to vector<4x2x8xf32>
    %68 = vector.shape_cast %67 : vector<4x2x8xf32> to vector<4x2x8x1xf32>
    %69 = tpu.reciprocal %68 {approx = true} : vector<4x2x8x1xf32> -> vector<4x2x8x1xf32>
    %70 = vector.broadcast %69 : vector<4x2x8x1xf32> to vector<4x2x8x8xf32>
    %71 = arith.mulf %66, %70 : vector<4x2x8x8xf32>
    %72 = vector.shape_cast %71 : vector<4x2x8x8xf32> to vector<8x8x8xf32>
    %73 = arith.truncf %72 : vector<8x8x8xf32> to vector<8x8x8xbf16>
    "tpu.trace_start"() <{level = 10 : i32, message = "bqk,bkd->bqd"}> : () -> ()
    %cst_21 = arith.constant dense<0.000000e+00> : vector<8x8x8xf32>
    %74 = tpu.matmul %73, %48, %cst_21 {dimension_numbers = #tpu.dot_dimension_numbers<[2], [1], [1], [2], [0, 0, 0, 1, 1, 2], [0], [0]>} : vector<8x8x8xbf16>, vector<8x8x8xbf16>, vector<8x8x8xf32> -> vector<8x8x8xf32>
    "tpu.trace_stop"() : () -> ()
    %75 = vector.shape_cast %74 : vector<8x8x8xf32> to vector<4x16x8xf32>
    %76 = vector.extract_strided_slice %75 {offsets = [0, 0, 0], sizes = [1, 16, 8], strides = [1, 1, 1]} : vector<4x16x8xf32> to vector<1x16x8xf32>
    %77 = vector.shape_cast %76 : vector<1x16x8xf32> to vector<16x8xf32>
    %78 = vector.extract_strided_slice %75 {offsets = [1, 0, 0], sizes = [1, 16, 8], strides = [1, 1, 1]} : vector<4x16x8xf32> to vector<1x16x8xf32>
    %79 = vector.shape_cast %78 : vector<1x16x8xf32> to vector<16x8xf32>
    %80 = vector.extract_strided_slice %75 {offsets = [2, 0, 0], sizes = [1, 16, 8], strides = [1, 1, 1]} : vector<4x16x8xf32> to vector<1x16x8xf32>
    %81 = vector.shape_cast %80 : vector<1x16x8xf32> to vector<16x8xf32>
    %82 = vector.extract_strided_slice %75 {offsets = [3, 0, 0], sizes = [1, 16, 8], strides = [1, 1, 1]} : vector<4x16x8xf32> to vector<1x16x8xf32>
    %83 = vector.shape_cast %82 : vector<1x16x8xf32> to vector<16x8xf32>
    %84 = tpu.concatenate %77, %79, %81, %83 in 1 : vector<16x8xf32>, vector<16x8xf32>, vector<16x8xf32>, vector<16x8xf32> -> vector<16x32xf32>
    %85 = arith.truncf %84 : vector<16x32xf32> to vector<16x32xbf16>
    %c0_22 = arith.constant 0 : index
    %c0_23 = arith.constant 0 : index
    %c0_24 = arith.constant 0 : index
    %86 = vector.load %arg7[%c0_22, %c0_23, %c0_24] : memref<1x32x32xbf16, #tpu.memory_space<vmem>>, vector<1x32x32xbf16>
    %87 = vector.shape_cast %86 : vector<1x32x32xbf16> to vector<32x32xbf16>
    %cst_25 = arith.constant dense<0.000000e+00> : vector<16x32xf32>
    %88 = tpu.matmul %85, %87, %cst_25 {dimension_numbers = #tpu.dot_dimension_numbers<[1], [0], [0], [1], [0, 0, 1, 1], [], []>} : vector<16x32xbf16>, vector<32x32xbf16>, vector<16x32xf32> -> vector<16x32xf32>
    %89 = vector.extract_strided_slice %8 {offsets = [1, 0], sizes = [1, 32], strides = [1, 1]} : vector<13x96xf32> to vector<1x32xf32>
    %90 = vector.broadcast %89 : vector<1x32xf32> to vector<16x32xf32>
    %91 = arith.addf %88, %90 : vector<16x32xf32>
    %92 = arith.addf %91, %4 : vector<16x32xf32>
    %cst_26 = arith.constant dense<0.000000e+00> : vector<16xf32>
    %93 = vector.multi_reduction <add>, %92, %cst_26 [1] : vector<16x32xf32> to vector<16xf32>
    %94 = vector.shape_cast %93 : vector<16xf32> to vector<16x1xf32>
    %cst_27 = arith.constant 3.200000e+01 : f32
    %95 = vector.broadcast %cst_27 : f32 to vector<16x1xf32>
    %96 = arith.divf %94, %95 : vector<16x1xf32>
    %97 = vector.broadcast %96 : vector<16x1xf32> to vector<16x32xf32>
    %98 = arith.subf %92, %97 : vector<16x32xf32>
    %99 = arith.mulf %98, %98 : vector<16x32xf32>
    %cst_28 = arith.constant dense<0.000000e+00> : vector<16xf32>
    %100 = vector.multi_reduction <add>, %99, %cst_28 [1] : vector<16x32xf32> to vector<16xf32>
    %101 = vector.shape_cast %100 : vector<16xf32> to vector<16x1xf32>
    %cst_29 = arith.constant 3.200000e+01 : f32
    %102 = vector.broadcast %cst_29 : f32 to vector<16x1xf32>
    %103 = arith.divf %101, %102 : vector<16x1xf32>
    %104 = vector.broadcast %96 : vector<16x1xf32> to vector<16x32xf32>
    %105 = arith.subf %92, %104 : vector<16x32xf32>
    %cst_30 = arith.constant 9.99999997E-7 : f32
    %106 = vector.broadcast %cst_30 : f32 to vector<16x1xf32>
    %107 = arith.addf %103, %106 : vector<16x1xf32>
    %108 = math.rsqrt %107 : vector<16x1xf32>
    %109 = vector.broadcast %108 : vector<16x1xf32> to vector<16x32xf32>
    %110 = arith.mulf %105, %109 : vector<16x32xf32>
    %111 = vector.extract_strided_slice %8 {offsets = [7, 0], sizes = [1, 32], strides = [1, 1]} : vector<13x96xf32> to vector<1x32xf32>
    %112 = vector.broadcast %111 : vector<1x32xf32> to vector<16x32xf32>
    %113 = arith.mulf %110, %112 : vector<16x32xf32>
    %114 = vector.extract_strided_slice %8 {offsets = [8, 0], sizes = [1, 32], strides = [1, 1]} : vector<13x96xf32> to vector<1x32xf32>
    %115 = vector.broadcast %114 : vector<1x32xf32> to vector<16x32xf32>
    %116 = arith.addf %113, %115 : vector<16x32xf32>
    %117 = arith.truncf %116 : vector<16x32xf32> to vector<16x32xbf16>
    %c0_31 = arith.constant 0 : index
    %c0_32 = arith.constant 0 : index
    %c0_33 = arith.constant 0 : index
    %118 = vector.load %arg8[%c0_31, %c0_32, %c0_33] : memref<1x32x32xbf16, #tpu.memory_space<vmem>>, vector<1x32x32xbf16>
    %119 = vector.shape_cast %118 : vector<1x32x32xbf16> to vector<32x32xbf16>
    %cst_34 = arith.constant dense<0.000000e+00> : vector<16x32xf32>
    %120 = tpu.matmul %117, %119, %cst_34 {dimension_numbers = #tpu.dot_dimension_numbers<[1], [0], [0], [1], [0, 0, 1, 1], [], []>} : vector<16x32xbf16>, vector<32x32xbf16>, vector<16x32xf32> -> vector<16x32xf32>
    %121 = vector.extract_strided_slice %8 {offsets = [2, 0], sizes = [1, 32], strides = [1, 1]} : vector<13x96xf32> to vector<1x32xf32>
    %122 = vector.broadcast %121 : vector<1x32xf32> to vector<16x32xf32>
    %123 = arith.addf %120, %122 : vector<16x32xf32>
    %124 = arith.truncf %6 : vector<16x32xf32> to vector<16x32xbf16>
    %c0_35 = arith.constant 0 : index
    %c0_36 = arith.constant 0 : index
    %c0_37 = arith.constant 0 : index
    %125 = vector.load %arg9[%c0_35, %c0_36, %c0_37] : memref<1x32x64xbf16, #tpu.memory_space<vmem>>, vector<1x32x64xbf16>
    %126 = vector.shape_cast %125 : vector<1x32x64xbf16> to vector<32x64xbf16>
    %cst_38 = arith.constant dense<0.000000e+00> : vector<16x64xf32>
    %127 = tpu.matmul %124, %126, %cst_38 {dimension_numbers = #tpu.dot_dimension_numbers<[1], [0], [0], [1], [0, 0, 1, 1], [], []>} : vector<16x32xbf16>, vector<32x64xbf16>, vector<16x64xf32> -> vector<16x64xf32>
    %128 = vector.extract_strided_slice %8 {offsets = [3, 0], sizes = [1, 64], strides = [1, 1]} : vector<13x96xf32> to vector<1x64xf32>
    %129 = vector.broadcast %128 : vector<1x64xf32> to vector<16x64xf32>
    %130 = arith.addf %127, %129 : vector<16x64xf32>
    %131 = arith.truncf %123 : vector<16x32xf32> to vector<16x32xbf16>
    %132 = vector.extract_strided_slice %131 {offsets = [0, 0], sizes = [16, 8], strides = [1, 1]} : vector<16x32xbf16> to vector<16x8xbf16>
    %133 = vector.shape_cast %132 : vector<16x8xbf16> to vector<2x8x8xbf16>
    %134 = vector.extract_strided_slice %131 {offsets = [0, 8], sizes = [16, 8], strides = [1, 1]} : vector<16x32xbf16> to vector<16x8xbf16>
    %135 = vector.shape_cast %134 : vector<16x8xbf16> to vector<2x8x8xbf16>
    %136 = vector.extract_strided_slice %131 {offsets = [0, 16], sizes = [16, 8], strides = [1, 1]} : vector<16x32xbf16> to vector<16x8xbf16>
    %137 = vector.shape_cast %136 : vector<16x8xbf16> to vector<2x8x8xbf16>
    %138 = vector.extract_strided_slice %131 {offsets = [0, 24], sizes = [16, 8], strides = [1, 1]} : vector<16x32xbf16> to vector<16x8xbf16>
    %139 = vector.shape_cast %138 : vector<16x8xbf16> to vector<2x8x8xbf16>
    %140 = tpu.concatenate %133, %135, %137, %139 in 0 : vector<2x8x8xbf16>, vector<2x8x8xbf16>, vector<2x8x8xbf16>, vector<2x8x8xbf16> -> vector<8x8x8xbf16>
    %141 = vector.extract_strided_slice %130 {offsets = [0, 0], sizes = [16, 32], strides = [1, 1]} : vector<16x64xf32> to vector<16x32xf32>
    %142 = arith.truncf %141 : vector<16x32xf32> to vector<16x32xbf16>
    %143 = vector.extract_strided_slice %142 {offsets = [0, 0], sizes = [16, 8], strides = [1, 1]} : vector<16x32xbf16> to vector<16x8xbf16>
    %144 = vector.shape_cast %143 : vector<16x8xbf16> to vector<2x8x8xbf16>
    %145 = vector.extract_strided_slice %142 {offsets = [0, 8], sizes = [16, 8], strides = [1, 1]} : vector<16x32xbf16> to vector<16x8xbf16>
    %146 = vector.shape_cast %145 : vector<16x8xbf16> to vector<2x8x8xbf16>
    %147 = vector.extract_strided_slice %142 {offsets = [0, 16], sizes = [16, 8], strides = [1, 1]} : vector<16x32xbf16> to vector<16x8xbf16>
    %148 = vector.shape_cast %147 : vector<16x8xbf16> to vector<2x8x8xbf16>
    %149 = vector.extract_strided_slice %142 {offsets = [0, 24], sizes = [16, 8], strides = [1, 1]} : vector<16x32xbf16> to vector<16x8xbf16>
    %150 = vector.shape_cast %149 : vector<16x8xbf16> to vector<2x8x8xbf16>
    %151 = tpu.concatenate %144, %146, %148, %150 in 0 : vector<2x8x8xbf16>, vector<2x8x8xbf16>, vector<2x8x8xbf16>, vector<2x8x8xbf16> -> vector<8x8x8xbf16>
    %152 = vector.extract_strided_slice %130 {offsets = [0, 32], sizes = [16, 32], strides = [1, 1]} : vector<16x64xf32> to vector<16x32xf32>
    %153 = arith.truncf %152 : vector<16x32xf32> to vector<16x32xbf16>
    %154 = vector.extract_strided_slice %153 {offsets = [0, 0], sizes = [16, 8], strides = [1, 1]} : vector<16x32xbf16> to vector<16x8xbf16>
    %155 = vector.shape_cast %154 : vector<16x8xbf16> to vector<2x8x8xbf16>
    %156 = vector.extract_strided_slice %153 {offsets = [0, 8], sizes = [16, 8], strides = [1, 1]} : vector<16x32xbf16> to vector<16x8xbf16>
    %157 = vector.shape_cast %156 : vector<16x8xbf16> to vector<2x8x8xbf16>
    %158 = vector.extract_strided_slice %153 {offsets = [0, 16], sizes = [16, 8], strides = [1, 1]} : vector<16x32xbf16> to vector<16x8xbf16>
    %159 = vector.shape_cast %158 : vector<16x8xbf16> to vector<2x8x8xbf16>
    %160 = vector.extract_strided_slice %153 {offsets = [0, 24], sizes = [16, 8], strides = [1, 1]} : vector<16x32xbf16> to vector<16x8xbf16>
    %161 = vector.shape_cast %160 : vector<16x8xbf16> to vector<2x8x8xbf16>
    %162 = tpu.concatenate %155, %157, %159, %161 in 0 : vector<2x8x8xbf16>, vector<2x8x8xbf16>, vector<2x8x8xbf16>, vector<2x8x8xbf16> -> vector<8x8x8xbf16>
    %c0_39 = arith.constant 0 : index
    %c0_40 = arith.constant 0 : index
    %c0_41 = arith.constant 0 : index
    %163 = vector.load %arg5[%c0_39, %c0_40, %c0_41] : memref<2x8x8xi8, #tpu.memory_space<vmem>>, vector<2x8x8xi8>
    "tpu.trace_start"() <{level = 10 : i32, message = "bqd,bkd->bqk"}> : () -> ()
    %cst_42 = arith.constant dense<0.000000e+00> : vector<8x8x8xf32>
    %164 = tpu.matmul %140, %151, %cst_42 {dimension_numbers = #tpu.dot_dimension_numbers<[2], [2], [1], [1], [0, 0, 0, 1, 1, 1], [0], [0]>} : vector<8x8x8xbf16>, vector<8x8x8xbf16>, vector<8x8x8xf32> -> vector<8x8x8xf32>
    "tpu.trace_stop"() : () -> ()
    %cst_43 = arith.constant 0.353553385 : f32
    %165 = vector.broadcast %cst_43 : f32 to vector<8x8x8xf32>
    %166 = arith.mulf %164, %165 : vector<8x8x8xf32>
    %167 = vector.shape_cast %166 : vector<8x8x8xf32> to vector<4x2x8x8xf32>
    %168 = arith.sitofp %163 : vector<2x8x8xi8> to vector<2x8x8xf32>
    %169 = vector.shape_cast %168 : vector<2x8x8xf32> to vector<1x2x8x8xf32>
    %170 = vector.shape_cast %169 : vector<1x2x8x8xf32> to vector<1x2x8x8xf32>
    %171 = vector.broadcast %170 : vector<1x2x8x8xf32> to vector<4x2x8x8xf32>
    %cst_44 = arith.constant 0.000000e+00 : f32
    %172 = vector.broadcast %cst_44 : f32 to vector<4x2x8x8xf32>
    %173 = arith.cmpf ogt, %171, %172 : vector<4x2x8x8xf32>
    %cst_45 = arith.constant -1.000000e+09 : f32
    %174 = vector.broadcast %cst_45 : f32 to vector<4x2x8x8xf32>
    %175 = arith.select %173, %167, %174 : vector<4x2x8x8xi1>, vector<4x2x8x8xf32>
    %cst_46 = arith.constant dense<0xFF800000> : vector<4x2x8xf32>
    %176 = vector.multi_reduction <maximumf>, %175, %cst_46 [3] : vector<4x2x8x8xf32> to vector<4x2x8xf32>
    %177 = vector.shape_cast %176 : vector<4x2x8xf32> to vector<4x2x8x1xf32>
    %178 = vector.broadcast %177 : vector<4x2x8x1xf32> to vector<4x2x8x8xf32>
    %179 = arith.subf %175, %178 : vector<4x2x8x8xf32>
    %180 = math.exp %179 : vector<4x2x8x8xf32>
    %cst_47 = arith.constant dense<0.000000e+00> : vector<4x2x8xf32>
    %181 = vector.multi_reduction <add>, %180, %cst_47 [3] : vector<4x2x8x8xf32> to vector<4x2x8xf32>
    %182 = vector.shape_cast %181 : vector<4x2x8xf32> to vector<4x2x8x1xf32>
    %183 = tpu.reciprocal %182 {approx = true} : vector<4x2x8x1xf32> -> vector<4x2x8x1xf32>
    %184 = vector.broadcast %183 : vector<4x2x8x1xf32> to vector<4x2x8x8xf32>
    %185 = arith.mulf %180, %184 : vector<4x2x8x8xf32>
    %186 = vector.shape_cast %185 : vector<4x2x8x8xf32> to vector<8x8x8xf32>
    %187 = arith.truncf %186 : vector<8x8x8xf32> to vector<8x8x8xbf16>
    "tpu.trace_start"() <{level = 10 : i32, message = "bqk,bkd->bqd"}> : () -> ()
    %cst_48 = arith.constant dense<0.000000e+00> : vector<8x8x8xf32>
    %188 = tpu.matmul %187, %162, %cst_48 {dimension_numbers = #tpu.dot_dimension_numbers<[2], [1], [1], [2], [0, 0, 0, 1, 1, 2], [0], [0]>} : vector<8x8x8xbf16>, vector<8x8x8xbf16>, vector<8x8x8xf32> -> vector<8x8x8xf32>
    "tpu.trace_stop"() : () -> ()
    %189 = vector.shape_cast %188 : vector<8x8x8xf32> to vector<4x16x8xf32>
    %190 = vector.extract_strided_slice %189 {offsets = [0, 0, 0], sizes = [1, 16, 8], strides = [1, 1, 1]} : vector<4x16x8xf32> to vector<1x16x8xf32>
    %191 = vector.shape_cast %190 : vector<1x16x8xf32> to vector<16x8xf32>
    %192 = vector.extract_strided_slice %189 {offsets = [1, 0, 0], sizes = [1, 16, 8], strides = [1, 1, 1]} : vector<4x16x8xf32> to vector<1x16x8xf32>
    %193 = vector.shape_cast %192 : vector<1x16x8xf32> to vector<16x8xf32>
    %194 = vector.extract_strided_slice %189 {offsets = [2, 0, 0], sizes = [1, 16, 8], strides = [1, 1, 1]} : vector<4x16x8xf32> to vector<1x16x8xf32>
    %195 = vector.shape_cast %194 : vector<1x16x8xf32> to vector<16x8xf32>
    %196 = vector.extract_strided_slice %189 {offsets = [3, 0, 0], sizes = [1, 16, 8], strides = [1, 1, 1]} : vector<4x16x8xf32> to vector<1x16x8xf32>
    %197 = vector.shape_cast %196 : vector<1x16x8xf32> to vector<16x8xf32>
    %198 = tpu.concatenate %191, %193, %195, %197 in 1 : vector<16x8xf32>, vector<16x8xf32>, vector<16x8xf32>, vector<16x8xf32> -> vector<16x32xf32>
    %199 = arith.truncf %198 : vector<16x32xf32> to vector<16x32xbf16>
    %c0_49 = arith.constant 0 : index
    %c0_50 = arith.constant 0 : index
    %c0_51 = arith.constant 0 : index
    %200 = vector.load %arg10[%c0_49, %c0_50, %c0_51] : memref<1x32x32xbf16, #tpu.memory_space<vmem>>, vector<1x32x32xbf16>
    %201 = vector.shape_cast %200 : vector<1x32x32xbf16> to vector<32x32xbf16>
    %cst_52 = arith.constant dense<0.000000e+00> : vector<16x32xf32>
    %202 = tpu.matmul %199, %201, %cst_52 {dimension_numbers = #tpu.dot_dimension_numbers<[1], [0], [0], [1], [0, 0, 1, 1], [], []>} : vector<16x32xbf16>, vector<32x32xbf16>, vector<16x32xf32> -> vector<16x32xf32>
    %203 = vector.extract_strided_slice %8 {offsets = [4, 0], sizes = [1, 32], strides = [1, 1]} : vector<13x96xf32> to vector<1x32xf32>
    %204 = vector.broadcast %203 : vector<1x32xf32> to vector<16x32xf32>
    %205 = arith.addf %202, %204 : vector<16x32xf32>
    %206 = arith.addf %205, %116 : vector<16x32xf32>
    %cst_53 = arith.constant dense<0.000000e+00> : vector<16xf32>
    %207 = vector.multi_reduction <add>, %206, %cst_53 [1] : vector<16x32xf32> to vector<16xf32>
    %208 = vector.shape_cast %207 : vector<16xf32> to vector<16x1xf32>
    %cst_54 = arith.constant 3.200000e+01 : f32
    %209 = vector.broadcast %cst_54 : f32 to vector<16x1xf32>
    %210 = arith.divf %208, %209 : vector<16x1xf32>
    %211 = vector.broadcast %210 : vector<16x1xf32> to vector<16x32xf32>
    %212 = arith.subf %206, %211 : vector<16x32xf32>
    %213 = arith.mulf %212, %212 : vector<16x32xf32>
    %cst_55 = arith.constant dense<0.000000e+00> : vector<16xf32>
    %214 = vector.multi_reduction <add>, %213, %cst_55 [1] : vector<16x32xf32> to vector<16xf32>
    %215 = vector.shape_cast %214 : vector<16xf32> to vector<16x1xf32>
    %cst_56 = arith.constant 3.200000e+01 : f32
    %216 = vector.broadcast %cst_56 : f32 to vector<16x1xf32>
    %217 = arith.divf %215, %216 : vector<16x1xf32>
    %218 = vector.broadcast %210 : vector<16x1xf32> to vector<16x32xf32>
    %219 = arith.subf %206, %218 : vector<16x32xf32>
    %cst_57 = arith.constant 9.99999997E-7 : f32
    %220 = vector.broadcast %cst_57 : f32 to vector<16x1xf32>
    %221 = arith.addf %217, %220 : vector<16x1xf32>
    %222 = math.rsqrt %221 : vector<16x1xf32>
    %223 = vector.broadcast %222 : vector<16x1xf32> to vector<16x32xf32>
    %224 = arith.mulf %219, %223 : vector<16x32xf32>
    %225 = vector.extract_strided_slice %8 {offsets = [9, 0], sizes = [1, 32], strides = [1, 1]} : vector<13x96xf32> to vector<1x32xf32>
    %226 = vector.broadcast %225 : vector<1x32xf32> to vector<16x32xf32>
    %227 = arith.mulf %224, %226 : vector<16x32xf32>
    %228 = vector.extract_strided_slice %8 {offsets = [10, 0], sizes = [1, 32], strides = [1, 1]} : vector<13x96xf32> to vector<1x32xf32>
    %229 = vector.broadcast %228 : vector<1x32xf32> to vector<16x32xf32>
    %230 = arith.addf %227, %229 : vector<16x32xf32>
    %231 = arith.truncf %230 : vector<16x32xf32> to vector<16x32xbf16>
    %c0_58 = arith.constant 0 : index
    %c0_59 = arith.constant 0 : index
    %c0_60 = arith.constant 0 : index
    %232 = vector.load %arg11[%c0_58, %c0_59, %c0_60] : memref<1x32x64xbf16, #tpu.memory_space<vmem>>, vector<1x32x64xbf16>
    %233 = vector.shape_cast %232 : vector<1x32x64xbf16> to vector<32x64xbf16>
    %cst_61 = arith.constant dense<0.000000e+00> : vector<16x64xf32>
    %234 = tpu.matmul %231, %233, %cst_61 {dimension_numbers = #tpu.dot_dimension_numbers<[1], [0], [0], [1], [0, 0, 1, 1], [], []>} : vector<16x32xbf16>, vector<32x64xbf16>, vector<16x64xf32> -> vector<16x64xf32>
    %235 = vector.extract_strided_slice %8 {offsets = [5, 0], sizes = [1, 64], strides = [1, 1]} : vector<13x96xf32> to vector<1x64xf32>
    %236 = vector.broadcast %235 : vector<1x64xf32> to vector<16x64xf32>
    %237 = arith.addf %234, %236 : vector<16x64xf32>
    %cst_62 = arith.constant 0.000000e+00 : f32
    %238 = vector.broadcast %cst_62 : f32 to vector<16x64xf32>
    %239 = arith.maximumf %237, %238 : vector<16x64xf32>
    %240 = arith.truncf %239 : vector<16x64xf32> to vector<16x64xbf16>
    %c0_63 = arith.constant 0 : index
    %c0_64 = arith.constant 0 : index
    %c0_65 = arith.constant 0 : index
    %241 = vector.load %arg12[%c0_63, %c0_64, %c0_65] : memref<1x64x32xbf16, #tpu.memory_space<vmem>>, vector<1x64x32xbf16>
    %242 = vector.shape_cast %241 : vector<1x64x32xbf16> to vector<64x32xbf16>
    %cst_66 = arith.constant dense<0.000000e+00> : vector<16x32xf32>
    %243 = tpu.matmul %240, %242, %cst_66 {dimension_numbers = #tpu.dot_dimension_numbers<[1], [0], [0], [1], [0, 0, 1, 1], [], []>} : vector<16x64xbf16>, vector<64x32xbf16>, vector<16x32xf32> -> vector<16x32xf32>
    %244 = vector.extract_strided_slice %8 {offsets = [6, 0], sizes = [1, 32], strides = [1, 1]} : vector<13x96xf32> to vector<1x32xf32>
    %245 = vector.broadcast %244 : vector<1x32xf32> to vector<16x32xf32>
    %246 = arith.addf %243, %245 : vector<16x32xf32>
    %247 = arith.addf %246, %230 : vector<16x32xf32>
    %cst_67 = arith.constant dense<0.000000e+00> : vector<16xf32>
    %248 = vector.multi_reduction <add>, %247, %cst_67 [1] : vector<16x32xf32> to vector<16xf32>
    %249 = vector.shape_cast %248 : vector<16xf32> to vector<16x1xf32>
    %cst_68 = arith.constant 3.200000e+01 : f32
    %250 = vector.broadcast %cst_68 : f32 to vector<16x1xf32>
    %251 = arith.divf %249, %250 : vector<16x1xf32>
    %252 = vector.broadcast %251 : vector<16x1xf32> to vector<16x32xf32>
    %253 = arith.subf %247, %252 : vector<16x32xf32>
    %254 = arith.mulf %253, %253 : vector<16x32xf32>
    %cst_69 = arith.constant dense<0.000000e+00> : vector<16xf32>
    %255 = vector.multi_reduction <add>, %254, %cst_69 [1] : vector<16x32xf32> to vector<16xf32>
    %256 = vector.shape_cast %255 : vector<16xf32> to vector<16x1xf32>
    %cst_70 = arith.constant 3.200000e+01 : f32
    %257 = vector.broadcast %cst_70 : f32 to vector<16x1xf32>
    %258 = arith.divf %256, %257 : vector<16x1xf32>
    %259 = vector.broadcast %251 : vector<16x1xf32> to vector<16x32xf32>
    %260 = arith.subf %247, %259 : vector<16x32xf32>
    %cst_71 = arith.constant 9.99999997E-7 : f32
    %261 = vector.broadcast %cst_71 : f32 to vector<16x1xf32>
    %262 = arith.addf %258, %261 : vector<16x1xf32>
    %263 = math.rsqrt %262 : vector<16x1xf32>
    %264 = vector.broadcast %263 : vector<16x1xf32> to vector<16x32xf32>
    %265 = arith.mulf %260, %264 : vector<16x32xf32>
    %266 = vector.extract_strided_slice %8 {offsets = [11, 0], sizes = [1, 32], strides = [1, 1]} : vector<13x96xf32> to vector<1x32xf32>
    %267 = vector.broadcast %266 : vector<1x32xf32> to vector<16x32xf32>
    %268 = arith.mulf %265, %267 : vector<16x32xf32>
    %269 = vector.extract_strided_slice %8 {offsets = [12, 0], sizes = [1, 32], strides = [1, 1]} : vector<13x96xf32> to vector<1x32xf32>
    %270 = vector.broadcast %269 : vector<1x32xf32> to vector<16x32xf32>
    %271 = arith.addf %268, %270 : vector<16x32xf32>
    %272 = vector.shape_cast %271 : vector<16x32xf32> to vector<2x8x32xf32>
    %c0_72 = arith.constant 0 : index
    %c0_73 = arith.constant 0 : index
    %c0_74 = arith.constant 0 : index
    %273 = vector.load %arg15[%c0_72, %c0_73, %c0_74] : memref<2x8x32xf32, #tpu.memory_space<vmem>>, vector<2x8x32xf32>
    tpu.vector_store %arg15[%c0_72, %c0_73, %c0_74], %272 {strides = array<i32>} : memref<2x8x32xf32, #tpu.memory_space<vmem>>, vector<2x8x32xf32>,
    %c1_i32 = arith.constant 1 : i32
    %274 = arith.cmpi eq, %arg1, %c1_i32 : i32
    %275 = arith.extui %274 : i1 to i32
    %c0_i32_75 = arith.constant 0 : i32
    %276 = arith.cmpi ne, %275, %c0_i32_75 : i32
    scf.if %276 {
      %277 = vector.shape_cast %271 : vector<16x32xf32> to vector<2x8x32xf32>
      %c0_76 = arith.constant 0 : index
      %c0_77 = arith.constant 0 : index
      %c0_78 = arith.constant 0 : index
      %278 = vector.load %arg14[%c0_76, %c0_77, %c0_78] : memref<2x8x32xf32, #tpu.memory_space<vmem>>, vector<2x8x32xf32>
      tpu.vector_store %arg14[%c0_76, %c0_77, %c0_78], %277 {strides = array<i32>} : memref<2x8x32xf32, #tpu.memory_space<vmem>>, vector<2x8x32xf32>,
    } else {
    }
    return
  }
  func.func @transform_0(%arg0: i32, %arg1: i32) -> (i32, i32, i32) {
    %c0_i32 = arith.constant 0 : i32
    %c0_i32_0 = arith.constant 0 : i32
    %c0_i32_1 = arith.constant 0 : i32
    return %arg0, %c0_i32, %c0_i32_0 : i32, i32, i32
  }
  func.func @transform_1(%arg0: i32, %arg1: i32) -> (i32, i32, i32) {
    %c0_i32 = arith.constant 0 : i32
    %c0_i32_0 = arith.constant 0 : i32
    %c0_i32_1 = arith.constant 0 : i32
    return %arg0, %c0_i32, %c0_i32_0 : i32, i32, i32
  }
  func.func @transform_2(%arg0: i32, %arg1: i32) -> (i32, i32, i32) {
    %c0_i32 = arith.constant 0 : i32
    %c0_i32_0 = arith.constant 0 : i32
    %c0_i32_1 = arith.constant 0 : i32
    return %arg0, %c0_i32, %c0_i32_0 : i32, i32, i32
  }
  func.func @transform_3(%arg0: i32, %arg1: i32) -> (i32, i32, i32) {
    %c0_i32 = arith.constant 0 : i32
    %c0_i32_0 = arith.constant 0 : i32
    %c0_i32_1 = arith.constant 0 : i32
    return %arg0, %c0_i32, %c0_i32_0 : i32, i32, i32
  }
  func.func @transform_4(%arg0: i32, %arg1: i32) -> (i32, i32, i32) {
    %c0_i32 = arith.constant 0 : i32
    %c0_i32_0 = arith.constant 0 : i32
    %c0_i32_1 = arith.constant 0 : i32
    return %arg1, %c0_i32, %c0_i32_0 : i32, i32, i32
  }
  func.func @transform_5(%arg0: i32, %arg1: i32) -> (i32, i32, i32) {
    %c0_i32 = arith.constant 0 : i32
    %c0_i32_0 = arith.constant 0 : i32
    %c0_i32_1 = arith.constant 0 : i32
    return %arg1, %c0_i32, %c0_i32_0 : i32, i32, i32
  }
  func.func @transform_6(%arg0: i32, %arg1: i32) -> (i32, i32, i32) {
    %c0_i32 = arith.constant 0 : i32
    %c0_i32_0 = arith.constant 0 : i32
    %c0_i32_1 = arith.constant 0 : i32
    return %arg1, %c0_i32, %c0_i32_0 : i32, i32, i32
  }
  func.func @transform_7(%arg0: i32, %arg1: i32) -> (i32, i32, i32) {
    %c0_i32 = arith.constant 0 : i32
    %c0_i32_0 = arith.constant 0 : i32
    %c0_i32_1 = arith.constant 0 : i32
    return %arg1, %c0_i32, %c0_i32_0 : i32, i32, i32
  }
  func.func @transform_8(%arg0: i32, %arg1: i32) -> (i32, i32, i32) {
    %c0_i32 = arith.constant 0 : i32
    %c0_i32_0 = arith.constant 0 : i32
    %c0_i32_1 = arith.constant 0 : i32
    return %arg1, %c0_i32, %c0_i32_0 : i32, i32, i32
  }
  func.func @transform_9(%arg0: i32, %arg1: i32) -> (i32, i32, i32) {
    %c0_i32 = arith.constant 0 : i32
    %c0_i32_0 = arith.constant 0 : i32
    %c0_i32_1 = arith.constant 0 : i32
    return %arg1, %c0_i32, %c0_i32_0 : i32, i32, i32
  }
  func.func @transform_10(%arg0: i32, %arg1: i32) -> (i32, i32, i32) {
    %c0_i32 = arith.constant 0 : i32
    %c0_i32_0 = arith.constant 0 : i32
    %c0_i32_1 = arith.constant 0 : i32
    return %arg1, %c0_i32, %c0_i32_0 : i32, i32, i32
  }
  func.func @transform_11(%arg0: i32, %arg1: i32) -> (i32, i32, i32) {
    %c0_i32 = arith.constant 0 : i32
    %c0_i32_0 = arith.constant 0 : i32
    %c0_i32_1 = arith.constant 0 : i32
    return %arg1, %c0_i32, %c0_i32_0 : i32, i32, i32
  }
  func.func @transform_12(%arg0: i32, %arg1: i32) -> (i32, i32, i32) {
    %c0_i32 = arith.constant 0 : i32
    %c0_i32_0 = arith.constant 0 : i32
    %c0_i32_1 = arith.constant 0 : i32
    return %arg0, %c0_i32, %c0_i32_0 : i32, i32, i32
  }
}

</mosaic_0001>

<bundles_post_ra>
// kernel: decoder_forward.1
= control target key start
LH: loop header
LB: loop body
LE: loop exit
PB: predicated region body
PF: predicated region fallthrough
CT: control target
= control target key end

     0   :  { %s4803_s0 = inlined_call_operand.vmem [shape: f32[2,8,32], index: 0, kind: input, shape index: {}]   ;;  %s4804_s1 = inlined_call_operand.vmem [shape: f32[2,8,32], index: 1, kind: input, shape index: {}]   ;;  %s4805_s2 = inlined_call_operand.vmem [shape: s8[2,8,8], index: 2, kind: input, shape index: {}]   ;;  %s4806_s3 = inlined_call_operand.vmem [shape: s8[2,8,8], index: 3, kind: input, shape index: {}]   ;;  %s4807_s4 = inlined_call_operand.vmem [shape: bf16[2,32,96], index: 4, kind: input, shape index: {}]   ;;  %s4808_s5 = inlined_call_operand.vmem [shape: bf16[2,32,32], index: 5, kind: input, shape index: {}]   ;;  %s4809_s6 = inlined_call_operand.vmem [shape: bf16[2,32,32], index: 6, kind: input, shape index: {}]   ;;  %s4810_s7 = inlined_call_operand.vmem [shape: bf16[2,32,64], index: 7, kind: input, shape index: {}]   ;;  %s4811_s8 = inlined_call_operand.vmem [shape: bf16[2,32,32], index: 8, kind: input, shape index: {}]   ;;  %s4812_s9 = inlined_call_operand.vmem [shape: bf16[2,32,64], index: 9, kind: input, shape index: {}]   ;;  %s4813_s10 = inlined_call_operand.vmem [shape: bf16[2,64,32], index: 10, kind: input, shape index: {}]   ;;  %s4814_s11 = inlined_call_operand.vmem [shape: f32[2,13,96], index: 11, kind: input, shape index: {}]   ;;  %s4815_s12 = inlined_call_operand.hbm [shape: f32[2,8,32], index: 12, kind: output, shape index: {}]  }
   0x1   :  { %4817 = sst [smem:[#allocation8_spill]] %s4807_s4 }
   0x2   :  { %4818 = sst [smem:[#allocation9_spill]] %s4808_s5 }
   0x3   :  { %4819 = sst [smem:[#allocation10_spill]] %s4809_s6 }
   0x4   :  { %17 = vsyncpa [#allocation4], 0  ;;  %s4134_s21 = smov 0   ;;  %s4136_s22 = smov 0  }
   0x5   :  { %s4138_s23 = smov 0  }
   0x6 LB: > { %4820 = sst [smem:[#allocation6_spill]] %s4051_s22  ;;  %s32_s25 = sadd.s32 1, %s4051_s22  ;;  %s4055_s23 = sphi %s4138_s23, %s23_s23   ;;  %s4051_s22 = sphi %s4136_s22, %s4828_s22   ;;  %s4047_s21 = sphi %s4134_s21, %s4827_s21  }
   0x7   : > { %p33_p0 = scmp.ge.s32.totalorder %s32_s25, 2  ;;  %p3381_p1 = scmp.ge.s32.totalorder %s4055_s23, 1 }
   0x8   : > { %p489_p2 = scmp.lt.s32.totalorder %s4055_s23, 3 }
   0x9   : > { %s4830_s25 = smov (%p33_p0, %s32_s25), 0 }
   0xa   : > { %4821 = sst [smem:[#allocation7_spill]] %s4830_s25  ;;  %p490_p3 = pnand %p3381_p1, %p489_p2 }
   0xb   : > { %p605_p4 = scmp.lt.s32.totalorder (!%p490_p3), %s4047_s21, 1  ;;  %s4822_s4 = sld [smem:[#allocation8_spill]] (!%p490_p3) }
   0xc   : > { %493 = sbr.rel (%p490_p3) target bundleno = 4525 (0x11ad), region = 68  ;;  %s4823_s5 = sld [smem:[#allocation9_spill]] (!%p490_p3) }
   0xd   : > { %s4824_s6 = sld [smem:[#allocation10_spill]] (!%p490_p3)  ;;  %p3398_p5 = scmp.ne.s32.totalorder (!%p490_p3), %s4047_s21, 0 }
  0x13   : > { %s606_s26 = scalar_select %p605_p4, %s4047_s21, 1 }
  0x14   : > { %650 = sbr.rel (%p3398_p5) target bundleno = 27 (0x1b), region = 72  ;;  %v651_v0 = vld [vmem:[%s4803_s0] sm:$0xff] (!%p3398_p5)  ;;  %vm653_vm0 = vcmask (!%p3398_p5), 261120   ;;  %v652_v1 = vld [vmem:[%s4803_s0 + $0x8] sm:$0xff] (!%p3398_p5) }
  0x15   : > { %s3477_s27 = sshll.u32 %s606_s26, 4  ;;  %s3483_s28 = sshll.u32 %s606_s26, 5  ;;  %654 = vst.msk [vmem:[#allocation2] sm:$0xff] (!%p3398_p5), %vm653_vm0, %v651_v0  ;;  %655 = vst.msk [vmem:[#allocation2 + $0x8] sm:$0xff] (!%p3398_p5), %vm653_vm0, %v652_v1 }
  0x16   : > { %s609_s13 = scalar_lea.vmem %s4822_s4, %s3477_s27  ;;  %s4163_s16 = scalar_lea.vmem %s4823_s5, %s3477_s27 }
  0x17   : > { %s4168_s19 = scalar_lea.vmem %s4824_s6, %s3477_s27  ;;  %s4173_s25 = scalar_lea.vmem %s4810_s7, %s3477_s27 }
  0x18   : > { %s4178_s29 = scalar_lea.vmem %s4811_s8, %s3477_s27  ;;  %s4183_s14 = scalar_lea.vmem %s4812_s9, %s3477_s27 }
  0x19   : > { %s4188_s17 = scalar_lea.vmem %s4813_s10, %s3483_s28  ;;  %s4193_s24 = scalar_lea.vmem %s4814_s11, %s3477_s27 }
  0x1b PF: > { %v3910_v2 = vld [vmem:[%s609_s13] sm:$0xff]   ;;  %v4057_v3 = vmov 0.0   ;;  %v3911_v4 = vld [vmem:[%s609_s13 + $0x8] sm:$0xff]   ;;  %vm4058_vm1 = vmmov 0   ;;  %vm683_vm2 = vcmask 261120   ;;  %v667_v8 = vlaneseq  ;;  %s4059_s5 = smov 112  }
  0x1c   : > { %3586 = vmatprep.subr.bf16.mxu1 %v4057_v3  ;;  %3600 = vmatprep.subr.bf16.mxu0 %v4057_v3  ;;  %v4206_v5 = vld [vmem:[#allocation2] sm:$0xff]  ;;  %v4208_v6 = vld [vmem:[#allocation2 + $0x8] sm:$0xff]  ;;  %s4060_s6 = smov 120   ;;  %s4061_s27 = smov 104   ;;  %vm750_vm3 = vcmask 64512   ;;  %vm1268_vm4 = vcmask 1043456  }
  0x1d   : > { %3587 = vmatpush3.bf16.msra.mxu1 %v3910_v2  ;;  %3590 = vmatprep.mubr.msk.bf16.mxu1 %vm4058_vm1, %v4057_v3  ;;  %v662_v7 = vpack.c.bf16 %v4208_v6, %v4206_v5  ;;  %v4219_v9 = vshrl.u32 %v667_v8, 7  ;;  %v4223_v11 = vld [vmem:[%s4193_s24] sm:$0xff]  ;;  %s4062_s28 = smov 96   ;;  %s4063_s13 = smov 64   ;;  %vm1674_vm7 = vcmask 130048   ;;  %vm1677_vm8 = vcmask 195584  }
  0x1e   : > { %3588 = vmatprep.subr.bf16.mxu1 %v4057_v3  ;;  %3602 = vmatprep.mubr.msk.bf16.mxu0 %vm4058_vm1, %v4057_v3  ;;  %v3492_v51 = vld [vmem:[%s4805_s2] sm:$0xf]   ;;  %s4064_s18 = smov 8   ;;  %s4065_s22 = smov 16   ;;  %vm3075_vm11 = vcmask 523264  }
  0x1f   : > { %v669_v10 = vsub.s32 0, %v4219_v9  ;;  %v3494_v52 = vunpack.c.1.s8 %v3492_v51  ;;  %v3493_v53 = vunpack.c.0.s8 %v3492_v51  ;;  %p3472_p6 = scmp.ne.s32.totalorder %s4047_s21, 1 }
  0x21   : > { %3589 = vmatpush3.bf16.msra.mxu1 %v3911_v4  ;;  %v670_v12 = vrot.slane %v4223_v11, %v669_v10  ;;  %v4313_v54 = vcvt.s32.f32 %v3494_v52  ;;  %v1155_v55 = vcvt.s32.f32 %v3493_v53 }
  0x22   : > { %3594 = vmatprep.subr.bf16.mxu1 %v4057_v3 }
  0x23   : > { %vm1158_vm5 = vcmp.gt.f32.partialorder %v4313_v54, 0.0  ;;  %vm1157_vm6 = vcmp.gt.f32.partialorder %v1155_v55, 0.0 }
  0x24   : > { %3591 = vmatmul.mubr.msk.bf16.vlgmr.msra.gmra.mrb[0].mxu1 %vm683_vm2, %v662_v7 }
  0x25   : > { %3596 = vmatprep.mubr.msk.bf16.mxu1 %vm4058_vm1, %v4057_v3 }
  0xf7   : > { %v721_v13 = vpop.f32.mrb[0].mxu1 }
  0xf8   : > { %v722_v14 = vadd.f32 %v721_v13, %v670_v12  ;;  %v3592_v15 = vpop.f32.mrb[1].mxu1 }
  0xf9   : > { %v724_v16 = vpop.f32.mrb[2].mxu1 }
  0xfa   : > { %v3485_v17 = vpack.c.bf16 %v722_v14, %v722_v14  ;;  %v725_v18 = vadd.f32 %v724_v16, %v670_v12  ;;  %v3593_v19 = vpop.f32.mrb[3].mxu1 }
  0xfc   : > { %738 = vrot.lane.b32.xlu1 %v3485_v17, %s4059_s5  ;;  %734 = vrot.lane.b32.xlu0 %v3485_v17, %s4060_s6  ;;  %v4230_v20 = vpack.c.bf16 %v725_v18, %v725_v18 }
 0x100   : > { %740 = vrot.lane.b32.xlu1 %v4230_v20, %s4059_s5  ;;  %736 = vrot.lane.b32.xlu0 %v4230_v20, %s4060_s6 }
 0x104   : > { %744 = vrot.lane.b32.xlu1 %v4230_v20, %s4061_s27  ;;  %742 = vrot.lane.b32.xlu0 %v3485_v17, %s4061_s27 }
 0x108   : > { %797 = vrot.lane.b32.xlu1 %v4230_v20, %s4062_s28  ;;  %748 = vrot.lane.b32.xlu0 %v3485_v17, %s4062_s28 }
 0x16e   : > { %v739_v21 = vpop.permute.xlu1 %738  ;;  %v735_v22 = vpop.permute.xlu0 %734 }
 0x16f   : > { %v4242_v23 = vcombine.low %v735_v22, %v735_v22  ;;  %v4246_v26 = vcombine.low %v739_v21, %v739_v21 }
 0x171   : > { %847 = vrot.lane.b32.xlu0 %v4242_v23, %s4062_s28 }
 0x172   : > { %v741_v24 = vpop.permute.xlu1 %740  ;;  %v737_v25 = vpop.permute.xlu0 %736 }
 0x173   : > { %v4248_v27 = vcombine.low %v737_v25, %v737_v25  ;;  %v4254_v30 = vcombine.low %v741_v24, %v741_v24 }
 0x175   : > { %947 = vrot.lane.b32.xlu0 %v4246_v26, %s4062_s28  ;;  %897 = vrot.lane.b32.xlu1 %v4248_v27, %s4062_s28 }
 0x176   : > { %v745_v28 = vpop.permute.xlu1 %744  ;;  %v743_v29 = vpop.permute.xlu0 %742 }
 0x177   : > { %v4256_v31 = vcombine.low %v743_v29, %v743_v29  ;;  %v4262_v34 = vcombine.low %v745_v28, %v745_v28 }
 0x179   : > { %997 = vrot.lane.b32.xlu1 %v4254_v30, %s4062_s28  ;;  %1047 = vrot.lane.b32.xlu0 %v4256_v31, %s4062_s28 }
 0x17a   : > { %v798_v32 = vpop.permute.xlu1 %797  ;;  %v749_v33 = vpop.permute.xlu0 %748 }
 0x17b   : > { %v755_v35 = vsel %vm750_vm3, %v749_v33, 0  ;;  %v803_v36 = vsel %vm750_vm3, %v798_v32, 0 }
 0x17c   : > { %3595 = vmatpush3.bf16.xpose.msra.mxu1 %v755_v35  ;;  %3601 = vmatpush3.bf16.xpose.msra.mxu0 %v803_v36 }
 0x17d   : > { %1097 = vrot.lane.b32.xlu1 %v4262_v34, %s4062_s28  ;;  %3606 = vmatprep.subr.bf16.mxu1 %v4057_v3 }
 0x17e   : > { %3612 = vmatprep.subr.bf16.mxu0 %v4057_v3 }
 0x181   : > { %1263 = vrot.lane.b32.xlu1 %v3485_v17, %s4063_s13 }
 0x183   : > { %3597 = vmatmul.mubr.msk.bf16.vlgmr.msra.gmra.mrb[4].mxu1 %vm750_vm3, %v3485_v17  ;;  %3603 = vmatmul.mubr.msk.bf16.vlgmr.msra.gmra.mrb[0].mxu0 %vm750_vm3, %v4230_v20 }
 0x184   : > { %3608 = vmatprep.mubr.msk.bf16.mxu1 %vm4058_vm1, %v4057_v3  ;;  %3614 = vmatprep.mubr.msk.bf16.mxu0 %vm4058_vm1, %v4057_v3 }
 0x1e3   : > { %v848_v37 = vpop.permute.xlu0 %847 }
 0x1e4   : > { %v853_v38 = vsel %vm750_vm3, %v848_v37, 0 }
 0x1e5   : > { %3607 = vmatpush3.bf16.xpose.msra.mxu1 %v853_v38 }
 0x1e6   : > { %3618 = vmatprep.subr.bf16.mxu1 %v4057_v3 }
 0x1e7   : > { %v898_v39 = vpop.permute.xlu1 %897  ;;  %v948_v41 = vpop.permute.xlu0 %947 }
 0x1e8   : > { %v903_v40 = vsel %vm750_vm3, %v898_v39, 0  ;;  %v953_v42 = vsel %vm750_vm3, %v948_v41, 0 }
 0x1e9   : > { %3613 = vmatpush3.bf16.xpose.msra.mxu0 %v903_v40 }
 0x1ea   : > { %3624 = vmatprep.subr.bf16.mxu0 %v4057_v3 }
 0x1eb   : > { %v998_v43 = vpop.permute.xlu1 %997  ;;  %v1048_v45 = vpop.permute.xlu0 %1047 }
 0x1ec   : > { %3609 = vmatmul.mubr.msk.bf16.vlgmr.msra.gmra.mrb[8].mxu1 %vm750_vm3, %v735_v22  ;;  %v1003_v44 = vsel %vm750_vm3, %v998_v43, 0  ;;  %v1053_v47 = vsel %vm750_vm3, %v1048_v45, 0 }
 0x1ed   : > { %3619 = vmatpush3.bf16.xpose.msra.mxu1 %v953_v42  ;;  %3620 = vmatprep.mubr.msk.bf16.mxu1 %vm4058_vm1, %v4057_v3 }
 0x1ee   : > { %3630 = vmatprep.subr.bf16.mxu1 %v4057_v3 }
 0x1ef   : > { %v1098_v46 = vpop.permute.xlu1 %1097 }
 0x1f0   : > { %3615 = vmatmul.mubr.msk.bf16.vlgmr.msra.gmra.mrb[4].mxu0 %vm750_vm3, %v737_v25  ;;  %v1103_v48 = vsel %vm750_vm3, %v1098_v46, 0 }
 0x1f1   : > { %3625 = vmatpush3.bf16.xpose.msra.mxu0 %v1003_v44  ;;  %3626 = vmatprep.mubr.msk.bf16.mxu0 %vm4058_vm1, %v4057_v3 }
 0x1f2   : > { %3636 = vmatprep.subr.bf16.mxu0 %v4057_v3 }
 0x1f3   : > { %v1264_v49 = vpop.permute.xlu1 %1263 }
 0x1f4   : > { %3621 = vmatmul.mubr.msk.bf16.vlgmr.msra.gmra.mrb[12].mxu1 %vm750_vm3, %v739_v21  ;;  %v1270_v50 = vsel %vm1268_vm4, %v1264_v49, 0 }
 0x1f5   : > { %3631 = vmatpush3.bf16.xpose.msra.mxu1 %v1053_v47  ;;  %3632 = vmatprep.mubr.msk.bf16.mxu1 %vm4058_vm1, %v4057_v3 }
 0x1f6   : > { %3642 = vmatprep.subr.bf16.mxu1 %v4057_v3 }
 0x1f8   : > { %3627 = vmatmul.mubr.msk.bf16.vlgmr.msra.gmra.mrb[8].mxu0 %vm750_vm3, %v741_v24 }
 0x1f9   : > { %3637 = vmatpush3.bf16.xpose.msra.mxu0 %v1103_v48  ;;  %3638 = vmatprep.mubr.msk.bf16.mxu0 %vm4058_vm1, %v4057_v3 }
 0x1fa   : > { %3648 = vmatprep.subr.bf16.mxu0 %v4057_v3 }
 0x1fc   : > { %3633 = vmatmul.mubr.msk.bf16.vlgmr.msra.gmra.mrb[16].mxu1 %vm750_vm3, %v743_v29 }
 0x1fd   : > { %3643 = vmatpush3.bf16.msra.mxu1 %v1270_v50  ;;  %3644 = vmatprep.mubr.msk.bf16.mxu1 %vm4058_vm1, %v4057_v3 }
 0x1fe   : > { %3654 = vmatprep.subr.bf16.mxu1 %v4057_v3 }
 0x200   : > { %3639 = vmatmul.mubr.msk.bf16.vlgmr.msra.gmra.mrb[12].mxu0 %vm750_vm3, %v745_v28 }
 0x201   : > { %3650 = vmatprep.mubr.msk.bf16.mxu0 %vm4058_vm1, %v4057_v3 }
 0x256   : > { %v791_v56 = vpop.f32.mrb[4].mxu1  ;;  %v839_v57 = vpop.f32.mrb[0].mxu0 }
 0x257   : > { %v1145_v58 = vmul.f32 0.35355338, %v791_v56  ;;  %v1146_v59 = vmul.f32 0.35355338, %v839_v57  ;;  %v3598_v60 = vpop.f32.mrb[5].mxu1  ;;  %v3604_v61 = vpop.f32.mrb[1].mxu0 }
 0x258   : > { %v794_v62 = vpop.f32.mrb[6].mxu1  ;;  %v842_v63 = vpop.f32.mrb[2].mxu0 }
 0x259   : > { %v3599_v0 = vpop.f32.mrb[7].mxu1  ;;  %v3605_v1 = vpop.f32.mrb[3].mxu0  ;;  %v1160_v2 = vsel %vm1158_vm5, %v1146_v59, -1e+09  ;;  %v1159_v4 = vsel %vm1157_vm6, %v1145_v58, -1e+09 }
 0x25a   : > { %v1170_v7 = vsel %vm750_vm3, %v1160_v2, -inf  ;;  %v1167_v8 = vsel %vm750_vm3, %v1159_v4, -inf }
 0x25b   : > { %1171 = vmax.xlane.f32.xlu1 %v1170_v7  ;;  %1168 = vmax.xlane.f32.xlu0 %v1167_v8 }
 0x2bf   : > { %v889_v12 = vpop.f32.mrb[8].mxu1 }
 0x2c0   : > { %v1147_v13 = vmul.f32 0.35355338, %v889_v12  ;;  %v3610_v14 = vpop.f32.mrb[9].mxu1 }
 0x2c1   : > { %v892_v15 = vpop.f32.mrb[10].mxu1 }
 0x2c2   : > { %v3611_v16 = vpop.f32.mrb[11].mxu1  ;;  %v1161_v17 = vsel %vm1157_vm6, %v1147_v13, -1e+09 }
 0x2c3   : > { %v939_v18 = vpop.f32.mrb[4].mxu0  ;;  %v1173_v19 = vsel %vm750_vm3, %v1161_v17, -inf }
 0x2c4   : > { %v1148_v21 = vmul.f32 0.35355338, %v939_v18  ;;  %v3616_v22 = vpop.f32.mrb[5].mxu0  ;;  %1174 = vmax.xlane.f32.xlu0 %v1173_v19 }
 0x2c5   : > { %v942_v24 = vpop.f32.mrb[6].mxu0 }
 0x2c6   : > { %v3617_v25 = vpop.f32.mrb[7].mxu0  ;;  %v1162_v28 = vsel %vm1158_vm5, %v1148_v21, -1e+09 }
 0x2c7   : > { %v989_v29 = vpop.f32.mrb[12].mxu1  ;;  %v1176_v32 = vsel %vm750_vm3, %v1162_v28, -inf }
 0x2c8   : > { %v1149_v33 = vmul.f32 0.35355338, %v989_v29  ;;  %1177 = vmax.xlane.f32.xlu0 %v1176_v32  ;;  %v3622_v35 = vpop.f32.mrb[13].mxu1 }
 0x2c9   : > { %v992_v36 = vpop.f32.mrb[14].mxu1 }
 0x2ca   : > { %v3623_v37 = vpop.f32.mrb[15].mxu1  ;;  %v4327_v38 = vsel %vm1157_vm6, %v1149_v33, -1e+09 }
 0x2cb   : > { %v1039_v39 = vpop.f32.mrb[8].mxu0  ;;  %v1179_v40 = vsel %vm750_vm3, %v4327_v38, -inf }
 0x2cc   : > { %v1150_v41 = vmul.f32 0.35355338, %v1039_v39  ;;  %v3628_v42 = vpop.f32.mrb[9].mxu0  ;;  %1180 = vmax.xlane.f32.xlu1 %v1179_v40 }
 0x2cd   : > { %v1042_v43 = vpop.f32.mrb[10].mxu0 }
 0x2ce   : > { %v3629_v44 = vpop.f32.mrb[11].mxu0  ;;  %v4333_v45 = vsel %vm1158_vm5, %v1150_v41, -1e+09 }
 0x2cf   : > { %v1089_v46 = vpop.f32.mrb[16].mxu1  ;;  %v1182_v47 = vsel %vm750_vm3, %v4333_v45, -inf }
 0x2d0   : > { %v1151_v48 = vmul.f32 0.35355338, %v1089_v46  ;;  %1183 = vmax.xlane.f32.xlu0 %v1182_v47  ;;  %v3634_v49 = vpop.f32.mrb[17].mxu1 }
 0x2d1   : > { %v1092_v50 = vpop.f32.mrb[18].mxu1 }
 0x2d2   : > { %v3635_v51 = vpop.f32.mrb[19].mxu1  ;;  %v1165_v52 = vsel %vm1157_vm6, %v1151_v48, -1e+09 }
 0x2d3   : > { %v1139_v53 = vpop.f32.mrb[12].mxu0  ;;  %v1185_v56 = vsel %vm750_vm3, %v1165_v52, -inf }
 0x2d4   : > { %v1152_v57 = vmul.f32 0.35355338, %v1139_v53  ;;  %v3640_v58 = vpop.f32.mrb[13].mxu0  ;;  %1186 = vmax.xlane.f32.xlu1 %v1185_v56 }
 0x2d5   : > { %v1142_v59 = vpop.f32.mrb[14].mxu0 }
 0x2d6   : > { %v3641_v60 = vpop.f32.mrb[15].mxu0  ;;  %v1166_v61 = vsel %vm1158_vm5, %v1152_v57, -1e+09 }
 0x2d7   : > { %v1188_v62 = vsel %vm750_vm3, %v1166_v61, -inf }
 0x2d8   : > { %1189 = vmax.xlane.f32.xlu0 %v1188_v62 }
 0x2e5   : > { %1360 = vrot.lane.b32.xlu1 %v4242_v23, %s4063_s13 }
 0x2e8   : > { %v1172_v55 = vpop.xlane.xlu1 %1171  ;;  %v1169_v63 = vpop.xlane.xlu0 %1168 }
 0x2e9   : > { %1408 = vrot.lane.b32.xlu1 %v4248_v27, %s4063_s13  ;;  %v1192_v0 = vsub.f32 %v1160_v2, %v1172_v55  ;;  %v1191_v1 = vsub.f32 %v1159_v4, %v1169_v63 }
 0x2eb   : > { %v1201_v7 = vmul.f32 1.442695, %v1192_v0  ;;  %v1199_v8 = vmul.f32 1.442695, %v1191_v1 }
 0x2ed   : > { %3926 = vpow2.f32 %v1201_v7 }
 0x2ee   : > { %1312 = vrot.lane.b32.xlu0 %v4230_v20, %s4063_s13  ;;  %3928 = vpow2.f32 %v1199_v8 }
 0x2f7   : > { %v3927_v54 = vpop.eup %3926 }
 0x2f8   : > { %v3929_v12 = vpop.eup %3928  ;;  %v1218_v13 = vsel %vm750_vm3, %v3927_v54, 0.0 }
 0x2f9   : > { %v1215_v23 = vsel %vm750_vm3, %v3929_v12, 0.0 }
 0x30d   : > { %1219 = vadd.xlane.f32.xlu0 %v1218_v13  ;;  %1216 = vadd.xlane.f32.xlu1 %v1215_v23 }
 0x351   : > { %v1175_v27 = vpop.xlane.xlu0 %1174 }
 0x352   : > { %v1193_v14 = vsub.f32 %v1161_v17, %v1175_v27 }
 0x354   : > { %v1203_v15 = vmul.f32 1.442695, %v1193_v14 }
 0x355   : > { %v1178_v20 = vpop.xlane.xlu0 %1177 }
 0x356   : > { %3930 = vpow2.f32 %v1203_v15  ;;  %v1194_v16 = vsub.f32 %v1162_v28, %v1178_v20 }
 0x358   : > { %v1205_v2 = vmul.f32 1.442695, %v1194_v16 }
 0x359   : > { %v1181_v28 = vpop.xlane.xlu1 %1180 }
 0x35a   : > { %3932 = vpow2.f32 %v1205_v2  ;;  %v1195_v29 = vsub.f32 %v4327_v38, %v1181_v28 }
 0x35c   : > { %v1207_v35 = vmul.f32 1.442695, %v1195_v29 }
 0x35d   : > { %v1184_v18 = vpop.xlane.xlu0 %1183 }
 0x35e   : > { %v1196_v33 = vsub.f32 %v4333_v45, %v1184_v18  ;;  %3934 = vpow2.f32 %v1207_v35 }
 0x360   : > { %v4350_v4 = vpop.eup %3930  ;;  %v1209_v37 = vmul.f32 1.442695, %v1196_v33 }
 0x361   : > { %v1221_v19 = vsel %vm750_vm3, %v4350_v4, 0.0  ;;  %v1187_v32 = vpop.xlane.xlu1 %1186 }
 0x362   : > { %1222 = vadd.xlane.f32.xlu1 %v1221_v19  ;;  %v1197_v36 = vsub.f32 %v1165_v52, %v1187_v32  ;;  %3936 = vpow2.f32 %v1209_v37 }
 0x364   : > { %v4354_v21 = vpop.eup %3932  ;;  %v1211_v39 = vmul.f32 1.442695, %v1197_v36 }
 0x365   : > { %v1190_v22 = vpop.xlane.xlu0 %1189  ;;  %v1224_v24 = vsel %vm750_vm3, %v4354_v21, 0.0  ;;  %v1361_v42 = vpop.permute.xlu1 %1360 }
 0x366   : > { %1225 = vadd.xlane.f32.xlu0 %v1224_v24  ;;  %v1198_v40 = vsub.f32 %v1166_v61, %v1190_v22  ;;  %3938 = vpow2.f32 %v1211_v39  ;;  %v1366_v60 = vsel %vm1268_vm4, %v1361_v42, 0 }
 0x368   : > { %v1213_v41 = vmul.f32 1.442695, %v1198_v40 }
 0x369   : > { %v1313_v17 = vpop.permute.xlu0 %1312  ;;  %v1409_v43 = vpop.permute.xlu1 %1408 }
 0x36a   : > { %v1318_v25 = vsel %vm1268_vm4, %v1313_v17, 0  ;;  %3940 = vpow2.f32 %v1213_v41  ;;  %v1414_v59 = vsel %vm1268_vm4, %v1409_v43, 0 }
 0x36b   : > { %3649 = vmatpush3.bf16.msra.mxu0 %v1318_v25 }
 0x36c   : > { %3660 = vmatprep.subr.bf16.mxu0 %v4057_v3 }
 0x373   : > { %1504 = vrot.lane.b32.xlu1 %v4254_v30, %s4063_s13  ;;  %v4366_v30 = vpop.eup %3934 }
 0x374   : > { %v1227_v38 = vsel %vm750_vm3, %v4366_v30, 0.0 }
 0x37c   : > { %1456 = vrot.lane.b32.xlu0 %v4246_v26, %s4063_s13  ;;  %v4368_v26 = vpop.eup %3936 }
 0x37d   : > { %v4372_v44 = vpop.eup %3938  ;;  %v1230_v47 = vsel %vm750_vm3, %v4368_v26, 0.0 }
 0x37e   : > { %v1233_v48 = vsel %vm750_vm3, %v4372_v44, 0.0  ;;  %v4378_v49 = vpop.eup %3940 }
 0x37f   : > { %v1236_v50 = vsel %vm750_vm3, %v4378_v49, 0.0 }
 0x397   : > { %1228 = vadd.xlane.f32.xlu1 %v1227_v38 }
 0x39a   : > { %v1220_v45 = vpop.xlane.xlu0 %1219  ;;  %v1217_v46 = vpop.xlane.xlu1 %1216 }
 0x39b   : > { %3942 = vrcp.f32 %v1220_v45  ;;  %1231 = vadd.xlane.f32.xlu0 %v1230_v47  ;;  %1234 = vadd.xlane.f32.xlu1 %v1233_v48 }
 0x39c   : > { %3944 = vrcp.f32 %v1217_v46 }
 0x39f   : > { %1237 = vadd.xlane.f32.xlu0 %v1236_v50  ;;  %v3912_v50 = vld [vmem:[%s4163_s16] sm:$0xff]  }
 0x3a5   : > { %v3943_v51 = vpop.eup %3942 }
 0x3a6   : > { %v3945_v52 = vpop.eup %3944  ;;  %v1248_v53 = vmul.f32 %v3943_v51, %v3927_v54 }
 0x3a7   : > { %v1247_v56 = vmul.f32 %v3945_v52, %v3929_v12 }
 0x3a8   : > { %v1256_v57 = vpack.c.bf16 %v1248_v53, %v1248_v53 }
 0x3a9   : > { %v1255_v58 = vpack.c.bf16 %v1247_v56, %v1247_v56 }
 0x3aa   : > { %3651 = vmatmul.mubr.msk.bf16.vlgmr.msra.gmra.mrb[16].mxu0 %vm750_vm3, %v1256_v57 }
 0x3ab   : > { %3645 = vmatmul.mubr.msk.bf16.vlgmr.msra.gmra.mrb[20].mxu1 %vm750_vm3, %v1255_v58  ;;  %3661 = vmatpush3.bf16.msra.mxu0 %v1414_v59  ;;  %v3913_v58 = vld [vmem:[%s4163_s16 + $0x8] sm:$0xff]   ;;  %s4066_s16 = smov 24  }
 0x3ac   : > { %3655 = vmatpush3.bf16.msra.mxu1 %v1366_v60  ;;  %1600 = vrot.lane.b32.xlu1 %v4262_v34, %s4063_s13 }
 0x3ad   : > { %3656 = vmatprep.mubr.msk.bf16.mxu1 %vm4058_vm1, %v4057_v3  ;;  %3666 = vmatprep.subr.bf16.mxu1 %v4057_v3 }
 0x3ae   : > { %3662 = vmatprep.mubr.msk.bf16.mxu0 %vm4058_vm1, %v4057_v3  ;;  %3672 = vmatprep.subr.bf16.mxu0 %v4057_v3 }
 0x3b5   : > { %1552 = vrot.lane.b32.xlu0 %v4256_v31, %s4063_s13 }
 0x3ef   : > { %v1223_v61 = vpop.xlane.xlu1 %1222 }
 0x3f0   : > { %3946 = vrcp.f32 %v1223_v61 }
 0x3f3   : > { %v1226_v62 = vpop.xlane.xlu0 %1225  ;;  %v1505_v54 = vpop.permute.xlu1 %1504 }
 0x3f4   : > { %3948 = vrcp.f32 %v1226_v62  ;;  %v1510_v12 = vsel %vm1268_vm4, %v1505_v54, 0 }
 0x3f7   : > { %v1457_v63 = vpop.permute.xlu0 %1456 }
 0x3f8   : > { %v1462_v8 = vsel %vm1268_vm4, %v1457_v63, 0 }
 0x3fa   : > { %v3947_v55 = vpop.eup %3946 }
 0x3fb   : > { %v1249_v34 = vmul.f32 %v3947_v55, %v4350_v4 }
 0x3fd   : > { %v1257_v0 = vpack.c.bf16 %v1249_v34, %v1249_v34 }
 0x3fe   : > { %v3949_v1 = vpop.eup %3948 }
 0x3ff   : > { %v1250_v7 = vmul.f32 %v3949_v1, %v4354_v21  ;;  %3657 = vmatmul.mubr.msk.bf16.vlgmr.msra.gmra.mrb[24].mxu1 %vm750_vm3, %v1257_v0 }
 0x400   : > { %3667 = vmatpush3.bf16.msra.mxu1 %v1462_v8  ;;  %3668 = vmatprep.mubr.msk.bf16.mxu1 %vm4058_vm1, %v4057_v3 }
 0x401   : > { %v1258_v31 = vpack.c.bf16 %v1250_v7, %v1250_v7  ;;  %3678 = vmatprep.subr.bf16.mxu1 %v4057_v3 }
 0x403   : > { %3663 = vmatmul.mubr.msk.bf16.vlgmr.msra.gmra.mrb[20].mxu0 %vm750_vm3, %v1258_v31 }
 0x404   : > { %3673 = vmatpush3.bf16.msra.mxu0 %v1510_v12  ;;  %3674 = vmatprep.mubr.msk.bf16.mxu0 %vm4058_vm1, %v4057_v3 }
 0x405   : > { %3684 = vmatprep.subr.bf16.mxu0 %v4057_v3 }
 0x424   : > { %v1229_v13 = vpop.xlane.xlu1 %1228 }
 0x425   : > { %3950 = vrcp.f32 %v1229_v13 }
 0x428   : > { %v1232_v23 = vpop.xlane.xlu0 %1231  ;;  %v1235_v27 = vpop.xlane.xlu1 %1234 }
 0x429   : > { %3952 = vrcp.f32 %v1232_v23 }
 0x42a   : > { %3954 = vrcp.f32 %v1235_v27 }
 0x42c   : > { %v1238_v14 = vpop.xlane.xlu0 %1237  ;;  %v1601_v22 = vpop.permute.xlu1 %1600 }
 0x42d   : > { %3956 = vrcp.f32 %v1238_v14  ;;  %v1606_v28 = vsel %vm1268_vm4, %v1601_v22, 0 }
 0x42f   : > { %v3951_v15 = vpop.eup %3950 }
 0x430   : > { %v1251_v20 = vmul.f32 %v3951_v15, %v4366_v30  ;;  %v1553_v16 = vpop.permute.xlu0 %1552 }
 0x431   : > { %v1558_v21 = vsel %vm1268_vm4, %v1553_v16, 0 }
 0x432   : > { %v1259_v2 = vpack.c.bf16 %v1251_v20, %v1251_v20 }
 0x433   : > { %v3953_v4 = vpop.eup %3952 }
 0x434   : > { %v3955_v18 = vpop.eup %3954  ;;  %v1252_v19 = vmul.f32 %v3953_v4, %v4368_v26  ;;  %3669 = vmatmul.mubr.msk.bf16.vlgmr.msra.gmra.mrb[28].mxu1 %vm750_vm3, %v1259_v2 }
 0x435   : > { %3679 = vmatpush3.bf16.msra.mxu1 %v1558_v21  ;;  %3680 = vmatprep.mubr.msk.bf16.mxu1 %vm4058_vm1, %v4057_v3  ;;  %v1253_v24 = vmul.f32 %v3955_v18, %v4372_v44 }
 0x436   : > { %v1260_v17 = vpack.c.bf16 %v1252_v19, %v1252_v19  ;;  %3690 = vmatprep.subr.bf16.mxu1 %v4057_v3 }
 0x437   : > { %v3957_v25 = vpop.eup %3956  ;;  %v1261_v32 = vpack.c.bf16 %v1253_v24, %v1253_v24 }
 0x438   : > { %3675 = vmatmul.mubr.msk.bf16.vlgmr.msra.gmra.mrb[24].mxu0 %vm750_vm3, %v1260_v17  ;;  %v1254_v29 = vmul.f32 %v3957_v25, %v4378_v49  ;;  %v1687_v25 = vsub.s32 1, %v4219_v9 }
 0x439   : > { %3685 = vmatpush3.bf16.msra.mxu0 %v1606_v28  ;;  %3686 = vmatprep.mubr.msk.bf16.mxu0 %vm4058_vm1, %v4057_v3 }
 0x43a   : > { %3698 = vmatprep.subr.bf16.mxu0 %v4057_v3  ;;  %v1262_v33 = vpack.c.bf16 %v1254_v29, %v1254_v29  ;;  %v1688_v28 = vrot.slane %v4223_v11, %v1687_v25 }
 0x43c   : > { %3681 = vmatmul.mubr.msk.bf16.vlgmr.msra.gmra.mrb[32].mxu1 %vm750_vm3, %v1261_v32 }
 0x43d   : > { %3694 = vmatprep.mubr.msk.bf16.mxu1 %vm4058_vm1, %v4057_v3  ;;  %3691 = vmatpush3.bf16.msra.mxu1 %v3912_v50  ;;  %v658_v50 = vld [vmem:[%s4804_s1] sm:$0xff] }
 0x43e   : > { %3692 = vmatprep.subr.bf16.mxu1 %v4057_v3 }
 0x440   : > { %3687 = vmatmul.mubr.msk.bf16.vlgmr.msra.gmra.mrb[28].mxu0 %vm750_vm3, %v1262_v33 }
 0x441   : > { %3702 = vmatprep.mubr.msk.bf16.mxu0 %vm4058_vm1, %v4057_v3  ;;  %3693 = vmatpush3.bf16.msra.mxu1 %v3913_v58 }
 0x442   : > { %3706 = vmatprep.subr.bf16.mxu1 %v4057_v3 }
 0x47d   : > { %v1354_v35 = vpop.f32.mrb[16].mxu0 }
 0x47e   : > { %v1306_v36 = vpop.f32.mrb[20].mxu1  ;;  %v3652_v37 = vpop.f32.mrb[17].mxu0 }
 0x47f   : > { %v3646_v39 = vpop.f32.mrb[21].mxu1  ;;  %v1357_v40 = vpop.f32.mrb[18].mxu0 }
 0x480   : > { %v1309_v41 = vpop.f32.mrb[22].mxu1  ;;  %v3653_v42 = vpop.f32.mrb[19].mxu0 }
 0x481   : > { %v3647_v30 = vpop.f32.mrb[23].mxu1 }
 0x4d2   : > { %v1402_v26 = vpop.f32.mrb[24].mxu1 }
 0x4d3   : > { %v3658_v43 = vpop.f32.mrb[25].mxu1 }
 0x4d4   : > { %v1405_v38 = vpop.f32.mrb[26].mxu1 }
 0x4d5   : > { %v3659_v44 = vpop.f32.mrb[27].mxu1 }
 0x4d6   : > { %v1450_v45 = vpop.f32.mrb[20].mxu0 }
 0x4d7   : > { %v3880_v46 = vpack.i.bf16 %v1450_v45, %v1402_v26  ;;  %v3664_v47 = vpop.f32.mrb[21].mxu0 }
 0x4d8   : > { %v1453_v48 = vpop.f32.mrb[22].mxu0 }
 0x4d9   : > { %v3665_v49 = vpop.f32.mrb[23].mxu0  ;;  %3881 = vrot.lane.b32.xlu0 %v3880_v46, %s4064_s18  ;;  %v3914_v48 = vld [vmem:[%s4173_s25] sm:$0xff]  }
 0x4da   : > { %v3915_v49 = vld [vmem:[%s4173_s25 + $0x8] sm:$0xff]  }
 0x507   : > { %v1498_v51 = vpop.f32.mrb[28].mxu1 }
 0x508   : > { %v3670_v52 = vpop.f32.mrb[29].mxu1 }
 0x509   : > { %v1501_v53 = vpop.f32.mrb[30].mxu1 }
 0x50a   : > { %v3671_v56 = vpop.f32.mrb[31].mxu1  ;;  %v3916_v53 = vld [vmem:[%s4168_s19] sm:$0xff]  }
 0x50b   : > { %v1546_v57 = vpop.f32.mrb[24].mxu0  ;;  %3699 = vmatpush3.bf16.msra.mxu0 %v3916_v53  ;;  %v3917_v56 = vld [vmem:[%s4168_s19 + $0x8] sm:$0xff]  }
 0x50c   : > { %v3885_v59 = vpack.i.bf16 %v1546_v57, %v1498_v51  ;;  %v3676_v60 = vpop.f32.mrb[25].mxu0  ;;  %v659_v51 = vld [vmem:[%s4804_s1 + $0x8] sm:$0xff]  ;;  %3700 = vmatprep.subr.bf16.mxu0 %v4057_v3 }
 0x50d   : > { %v1549_v61 = vpop.f32.mrb[26].mxu0  ;;  %v1851_v52 = vpack.c.bf16 %v659_v51, %v658_v50 }
 0x50e   : > { %v3677_v62 = vpop.f32.mrb[27].mxu0  ;;  %3886 = vrot.lane.b32.xlu1 %v3885_v59, %s4065_s22 }
 0x50f   : > { %v1594_v55 = vpop.f32.mrb[32].mxu1  ;;  %3701 = vmatpush3.bf16.msra.mxu0 %v3917_v56 }
 0x510   : > { %v3682_v34 = vpop.f32.mrb[33].mxu1  ;;  %3714 = vmatprep.subr.bf16.mxu0 %v4057_v3 }
 0x511   : > { %v1597_v63 = vpop.f32.mrb[34].mxu1 }
 0x512   : > { %v3683_v0 = vpop.f32.mrb[35].mxu1 }
 0x513   : > { %v1642_v1 = vpop.f32.mrb[28].mxu0  ;;  %v4474_v0 = vld [vmem:[%s4193_s24 + $0x8] sm:$0x1f] }
 0x514   : > { %v3890_v7 = vpack.i.bf16 %v1642_v1, %v1594_v55  ;;  %v3688_v8 = vpop.f32.mrb[29].mxu0  ;;  %v1776_v55 = vsub.s32 7, %v4219_v9 }
 0x515   : > { %v1645_v54 = vpop.f32.mrb[30].mxu0  ;;  %v1783_v8 = vrot.slane %v4474_v0, %v669_v10 }
 0x516   : > { %v3689_v31 = vpop.f32.mrb[31].mxu0  ;;  %3891 = vrot.lane.b32.xlu0 %v3890_v7, %s4066_s16  ;;  %v1777_v34 = vrot.slane %v4223_v11, %v1776_v55 }
 0x54b   : > { %v3882_v12 = vpop.permute.xlu0 %3881 }
 0x54c   : > { %v3884_v23 = vunpack.i.h.bf16 %v3882_v12  ;;  %v3883_v27 = vunpack.i.l.bf16 %v3882_v12 }
 0x54e   : > { %v1673_v16 = vsel %vm750_vm3, %v1354_v35, %v3884_v23  ;;  %v1672_v2 = vsel %vm750_vm3, %v1306_v36, %v3883_v27 }
 0x580   : > { %v3887_v13 = vpop.permute.xlu1 %3886 }
 0x581   : > { %v3889_v14 = vunpack.i.h.bf16 %v3887_v13  ;;  %v3888_v15 = vunpack.i.l.bf16 %v3887_v13 }
 0x583   : > { %v1676_v19 = vsel %vm1674_vm7, %v1673_v16, %v3889_v14  ;;  %v1675_v21 = vsel %vm1674_vm7, %v1672_v2, %v3888_v15  ;;  %v1858_v14 = vsub.s32 3, %v4219_v9 }
 0x585   : > { %v1859_v10 = vrot.slane %v4223_v11, %v1858_v14 }
 0x588   : > { %v3892_v20 = vpop.permute.xlu0 %3891 }
 0x589   : > { %v3894_v4 = vunpack.i.h.bf16 %v3892_v20  ;;  %v3893_v18 = vunpack.i.l.bf16 %v3892_v20 }
 0x58b   : > { %v1679_v22 = vsel %vm1677_vm8, %v1676_v19, %v3894_v4  ;;  %v1678_v24 = vsel %vm1677_vm8, %v1675_v21, %v3893_v18 }
 0x58c   : > { %v1680_v17 = vpack.c.bf16 %v1679_v22, %v1678_v24 }
 0x58e   : > { %3695 = vmatmul.mubr.msk.bf16.vlgmr.msra.gmra.mrb[36].mxu1 %vm683_vm2, %v1680_v17  ;;  %v1793_v17 = vsub.s32 2, %v4219_v9 }
 0x58f   : > { %3710 = vmatprep.mubr.msk.bf16.mxu1 %vm4058_vm1, %v4057_v3  ;;  %3707 = vmatpush3.bf16.msra.mxu1 %v3914_v48 }
 0x590   : > { %3708 = vmatprep.subr.bf16.mxu1 %v4057_v3 }
 0x593   : > { %3709 = vmatpush3.bf16.msra.mxu1 %v3915_v49 }
 0x594   : > { %3720 = vmatprep.subr.bf16.mxu1 %v4057_v3 }
 0x596   : > { %3711 = vmatmul.mubr.msk.bf16.vlgmr.msra.gmra.mrb[40].mxu1 %vm683_vm2, %v1851_v52 }
 0x597   : > { %3722 = vmatprep.mubr.msk.bf16.mxu1 %vm4058_vm1, %v4057_v3 }
 0x661   : > { %v1738_v29 = vpop.f32.mrb[36].mxu1 }
 0x662   : > { %v1739_v32 = vadd.f32 %v1738_v29, %v1688_v28  ;;  %v3696_v33 = vpop.f32.mrb[37].mxu1 }
 0x663   : > { %v1741_v35 = vpop.f32.mrb[38].mxu1 }
 0x664   : > { %v1742_v36 = vadd.f32 %v1741_v35, %v1688_v28  ;;  %v3697_v37 = vpop.f32.mrb[39].mxu1  ;;  %v1745_v39 = vadd.f32 %v1739_v32, %v4206_v5  ;;  %v1794_v28 = vrot.slane %v4223_v11, %v1793_v17 }
 0x666   : > { %v1747_v40 = vsel %vm683_vm2, %v1745_v39, 0.0  ;;  %v1746_v41 = vadd.f32 %v1742_v36, %v4208_v6 }
 0x667   : > { %1748 = vadd.xlane.f32.xlu1 %v1747_v40 }
 0x668   : > { %v1750_v42 = vsel %vm683_vm2, %v1746_v41, 0.0 }
 0x669   : > { %1751 = vadd.xlane.f32.xlu0 %v1750_v42  ;;  %v1909_v15 = vpop.f32.mrb[40].mxu1 }
 0x66a   : > { %v1910_v20 = vadd.f32 %v1909_v15, %v1859_v10  ;;  %v3712_v16 = vpop.f32.mrb[41].mxu1 }
 0x66b   : > { %v1912_v2 = vpop.f32.mrb[42].mxu1 }
 0x66c   : > { %v3489_v4 = vpack.c.bf16 %v1910_v20, %v1910_v20  ;;  %v1913_v18 = vadd.f32 %v1912_v2, %v1859_v10  ;;  %v3713_v19 = vpop.f32.mrb[43].mxu1 }
 0x66e   : > { %v3490_v21 = vpack.c.bf16 %v1913_v18, %v1913_v18  ;;  %v1958_v22 = vsel %vm750_vm3, %v3489_v4, 0 }
 0x670   : > { %v2004_v24 = vsel %vm750_vm3, %v3490_v21, 0 }
 0x671   : > { %3721 = vmatpush3.bf16.xpose.msra.mxu1 %v2004_v24 }
 0x672   : > { %3732 = vmatprep.subr.bf16.mxu1 %v4057_v3 }
 0x6f4   : > { %v1749_v30 = vpop.xlane.xlu1 %1748 }
 0x6f5   : > { %v1754_v26 = vmul.f32 0.03125, %v1749_v30 }
 0x6f6   : > { %v1752_v43 = vpop.xlane.xlu0 %1751 }
 0x6f7   : > { %v1756_v38 = vsub.f32 %v1745_v39, %v1754_v26  ;;  %v1755_v44 = vmul.f32 0.03125, %v1752_v43 }
 0x6f9   : > { %v1757_v45 = vsub.f32 %v1746_v41, %v1755_v44  ;;  %v1758_v46 = vmul.f32 %v1756_v38, %v1756_v38 }
 0x6fb   : > { %v1760_v47 = vsel %vm683_vm2, %v1758_v46, 0.0  ;;  %v1759_v5 = vmul.f32 %v1757_v45, %v1757_v45 }
 0x6fc   : > { %1761 = vadd.xlane.f32.xlu0 %v1760_v47 }
 0x6fd   : > { %v1763_v6 = vsel %vm683_vm2, %v1759_v5, 0.0 }
 0x6fe   : > { %1764 = vadd.xlane.f32.xlu1 %v1763_v6 }
 0x70f   : > { %1942 = vrot.lane.b32.xlu1 %v3490_v21, %s4060_s6 }
 0x712   : > { %1940 = vrot.lane.b32.xlu0 %v3489_v4, %s4060_s6 }
 0x713   : > { %1944 = vrot.lane.b32.xlu1 %v3489_v4, %s4059_s5 }
 0x716   : > { %1946 = vrot.lane.b32.xlu0 %v3490_v21, %s4059_s5 }
 0x789   : > { %v1762_v57 = vpop.xlane.xlu0 %1761 }
 0x78a   : > { %v1766_v58 = vmul.f32 0.03125, %v1762_v57 }
 0x78b   : > { %v1765_v59 = vpop.xlane.xlu1 %1764 }
 0x78c   : > { %v1768_v60 = vadd.f32 1e-06, %v1766_v58  ;;  %v1767_v61 = vmul.f32 0.03125, %v1765_v59  ;;  %v3496_v59 = vld [vmem:[%s4806_s3] sm:$0xf]  }
 0x78d   : > { %v4504_v36 = vpop.permute.xlu0 %1940 }
 0x78e   : > { %3958 = vrsqrt.f32 %v1768_v60  ;;  %v1769_v62 = vadd.f32 1e-06, %v1767_v61  ;;  %v2050_v41 = vsel %vm750_vm3, %v4504_v36, 0  ;;  %v3497_v60 = vunpack.c.0.s8 %v3496_v59 }
 0x78f   : > { %v4508_v42 = vpop.permute.xlu1 %1942  ;;  %v3498_v61 = vunpack.c.1.s8 %v3496_v59 }
 0x790   : > { %3960 = vrsqrt.f32 %v1769_v62  ;;  %v2096_v11 = vsel %vm750_vm3, %v4508_v42, 0  ;;  %v2332_v62 = vcvt.s32.f32 %v3497_v60 }
 0x791   : > { %v4532_v43 = vpop.permute.xlu0 %1946  ;;  %v4575_v55 = vcvt.s32.f32 %v3498_v61 }
 0x792   : > { %v2188_v46 = vsel %vm750_vm3, %v4532_v43, 0  ;;  %vm2334_vm9 = vcmp.gt.f32.partialorder %v2332_v62, 0.0  ;;  %v3451_v62 = vcombine.low %v4508_v42, %v4508_v42 }
 0x793   : > { %v4530_v26 = vpop.permute.xlu1 %1944  ;;  %vm2335_vm10 = vcmp.gt.f32.partialorder %v4575_v55, 0.0 }
 0x794   : > { %v2142_v44 = vsel %vm750_vm3, %v4530_v26, 0  ;;  %v3453_v42 = vcombine.low %v4530_v26, %v4530_v26 }
 0x798   : > { %v3959_v63 = vpop.eup %3958 }
 0x799   : > { %v1772_v1 = vmul.f32 %v3959_v63, %v1756_v38 }
 0x79a   : > { %v3961_v7 = vpop.eup %3960 }
 0x79b   : > { %v1778_v54 = vmul.f32 %v1777_v34, %v1772_v1  ;;  %v1773_v31 = vmul.f32 %v3961_v7, %v1757_v45 }
 0x79d   : > { %v1779_v12 = vmul.f32 %v1777_v34, %v1773_v31  ;;  %v4479_v13 = vadd.f32 %v1783_v8, %v1778_v54 }
 0x79f   : > { %v4481_v23 = vadd.f32 %v1783_v8, %v1779_v12 }
 0x7a1   : > { %v1786_v27 = vpack.c.bf16 %v4481_v23, %v4479_v13 }
 0x7a3   : > { %3703 = vmatmul.mubr.msk.bf16.vlgmr.msra.gmra.mrb[32].mxu0 %vm683_vm2, %v1786_v27 }
 0x7a4   : > { %3716 = vmatprep.mubr.msk.bf16.mxu0 %vm4058_vm1, %v4057_v3  ;;  %3715 = vmatpush3.bf16.xpose.msra.mxu0 %v1958_v22 }
 0x7a5   : > { %3726 = vmatprep.subr.bf16.mxu0 %v4057_v3 }
 0x876   : > { %v1844_v29 = vpop.f32.mrb[32].mxu0 }
 0x877   : > { %v1845_v32 = vadd.f32 %v1844_v29, %v1794_v28  ;;  %v3704_v33 = vpop.f32.mrb[33].mxu0 }
 0x878   : > { %v1847_v35 = vpop.f32.mrb[34].mxu0 }
 0x879   : > { %v3487_v37 = vpack.c.bf16 %v1845_v32, %v1845_v32  ;;  %v1848_v39 = vadd.f32 %v1847_v35, %v1794_v28  ;;  %v3705_v40 = vpop.f32.mrb[35].mxu0 }
 0x87b   : > { %v3488_v30 = vpack.c.bf16 %v1848_v39, %v1848_v39  ;;  %3717 = vmatmul.mubr.msk.bf16.vlgmr.msra.gmra.mrb[36].mxu0 %vm750_vm3, %v3487_v37  ;;  %1922 = vrot.lane.b32.xlu1 %v3487_v37, %s4060_s6 }
 0x87c   : > { %3727 = vmatpush3.bf16.xpose.msra.mxu0 %v2050_v41  ;;  %3728 = vmatprep.mubr.msk.bf16.mxu0 %vm4058_vm1, %v4057_v3 }
 0x87d   : > { %1924 = vrot.lane.b32.xlu0 %v3488_v30, %s4060_s6  ;;  %3723 = vmatmul.mubr.msk.bf16.vlgmr.msra.gmra.mrb[44].mxu1 %vm750_vm3, %v3488_v30 }
 0x87e   : > { %3733 = vmatpush3.bf16.xpose.msra.mxu1 %v2096_v11  ;;  %3738 = vmatprep.subr.bf16.mxu0 %v4057_v3 }
 0x87f   : > { %1926 = vrot.lane.b32.xlu1 %v3487_v37, %s4059_s5  ;;  %3734 = vmatprep.mubr.msk.bf16.mxu1 %vm4058_vm1, %v4057_v3 }
 0x880   : > { %3744 = vmatprep.subr.bf16.mxu1 %v4057_v3 }
 0x881   : > { %1928 = vrot.lane.b32.xlu0 %v3488_v30, %s4059_s5 }
 0x883   : > { %1948 = vrot.lane.b32.xlu1 %v3489_v4, %s4061_s27 }
 0x885   : > { %1950 = vrot.lane.b32.xlu0 %v3490_v21, %s4061_s27 }
 0x887   : > { %1930 = vrot.lane.b32.xlu1 %v3487_v37, %s4061_s27 }
 0x889   : > { %1932 = vrot.lane.b32.xlu0 %v3488_v30, %s4061_s27 }
 0x88b   : > { %2488 = vrot.lane.b32.xlu1 %v3490_v21, %s4062_s28 }
 0x88d   : > { %2440 = vrot.lane.b32.xlu0 %v3489_v4, %s4062_s28 }
 0x8ed   : > { %v1923_v38 = vpop.permute.xlu1 %1922 }
 0x8ee   : > { %3729 = vmatmul.mubr.msk.bf16.vlgmr.msra.gmra.mrb[40].mxu0 %vm750_vm3, %v1923_v38 }
 0x8ef   : > { %3739 = vmatpush3.bf16.xpose.msra.mxu0 %v2142_v44  ;;  %v1925_v45 = vpop.permute.xlu0 %1924  ;;  %3740 = vmatprep.mubr.msk.bf16.mxu0 %vm4058_vm1, %v4057_v3 }
 0x8f0   : > { %3735 = vmatmul.mubr.msk.bf16.vlgmr.msra.gmra.mrb[48].mxu1 %vm750_vm3, %v1925_v45  ;;  %3750 = vmatprep.subr.bf16.mxu0 %v4057_v3 }
 0x8f1   : > { %3745 = vmatpush3.bf16.xpose.msra.mxu1 %v2188_v46  ;;  %v1927_v47 = vpop.permute.xlu1 %1926  ;;  %3746 = vmatprep.mubr.msk.bf16.mxu1 %vm4058_vm1, %v4057_v3 }
 0x8f2   : > { %3756 = vmatprep.subr.bf16.mxu1 %v4057_v3 }
 0x8f3   : > { %v1929_v5 = vpop.permute.xlu0 %1928 }
 0x8f5   : > { %v4546_v6 = vpop.permute.xlu1 %1948 }
 0x8f6   : > { %v2234_v48 = vsel %vm750_vm3, %v4546_v6, 0  ;;  %3741 = vmatmul.mubr.msk.bf16.vlgmr.msra.gmra.mrb[44].mxu0 %vm750_vm3, %v1927_v47 }
 0x8f7   : > { %v4551_v49 = vpop.permute.xlu0 %1950  ;;  %3751 = vmatpush3.bf16.xpose.msra.mxu0 %v2234_v48  ;;  %3752 = vmatprep.mubr.msk.bf16.mxu0 %vm4058_vm1, %v4057_v3 }
 0x8f8   : > { %v2280_v50 = vsel %vm750_vm3, %v4551_v49, 0  ;;  %3747 = vmatmul.mubr.msk.bf16.vlgmr.msra.gmra.mrb[52].mxu1 %vm750_vm3, %v1929_v5  ;;  %3762 = vmatprep.subr.bf16.mxu0 %v4057_v3 }
 0x8f9   : > { %v1931_v51 = vpop.permute.xlu1 %1930  ;;  %3757 = vmatpush3.bf16.xpose.msra.mxu1 %v2280_v50  ;;  %3758 = vmatprep.mubr.msk.bf16.mxu1 %vm4058_vm1, %v4057_v3 }
 0x8fa   : > { %3768 = vmatprep.subr.bf16.mxu1 %v4057_v3 }
 0x8fb   : > { %v1933_v52 = vpop.permute.xlu0 %1932 }
 0x8fd   : > { %v2489_v53 = vpop.permute.xlu1 %2488 }
 0x8fe   : > { %3753 = vmatmul.mubr.msk.bf16.vlgmr.msra.gmra.mrb[48].mxu0 %vm750_vm3, %v1931_v51  ;;  %v2494_v57 = vsel %vm1268_vm4, %v2489_v53, 0 }
 0x8ff   : > { %v2441_v56 = vpop.permute.xlu0 %2440  ;;  %3764 = vmatprep.mubr.msk.bf16.mxu0 %vm4058_vm1, %v4057_v3 }
 0x900   : > { %v2446_v58 = vsel %vm1268_vm4, %v2441_v56, 0  ;;  %3759 = vmatmul.mubr.msk.bf16.vlgmr.msra.gmra.mrb[56].mxu1 %vm750_vm3, %v1933_v52 }
 0x901   : > { %3763 = vmatpush3.bf16.msra.mxu0 %v2446_v58  ;;  %3769 = vmatpush3.bf16.msra.mxu1 %v2494_v57 }
 0x902   : > { %3774 = vmatprep.subr.bf16.mxu0 %v4057_v3  ;;  %3770 = vmatprep.mubr.msk.bf16.mxu1 %vm4058_vm1, %v4057_v3 }
 0x903   : > { %3780 = vmatprep.subr.bf16.mxu1 %v4057_v3 }
 0x94e   : > { %v1994_v34 = vpop.f32.mrb[36].mxu0 }
 0x94f   : > { %v2322_v63 = vmul.f32 0.35355338, %v1994_v34  ;;  %v3718_v1 = vpop.f32.mrb[37].mxu0 }
 0x950   : > { %v1997_v7 = vpop.f32.mrb[38].mxu0  ;;  %v2040_v8 = vpop.f32.mrb[44].mxu1 }
 0x951   : > { %v2323_v54 = vmul.f32 0.35355338, %v2040_v8  ;;  %v3719_v31 = vpop.f32.mrb[39].mxu0  ;;  %v3724_v12 = vpop.f32.mrb[45].mxu1  ;;  %v4579_v27 = vsel %vm2334_vm9, %v2322_v63, -1e+09 }
 0x952   : > { %v2043_v10 = vpop.f32.mrb[46].mxu1  ;;  %v2344_v15 = vsel %vm750_vm3, %v4579_v27, -inf }
 0x953   : > { %2345 = vmax.xlane.f32.xlu1 %v2344_v15  ;;  %v3725_v20 = vpop.f32.mrb[47].mxu1  ;;  %v2337_v16 = vsel %vm2335_vm10, %v2323_v54, -1e+09  ;;  %v3449_v10 = vcombine.low %v4504_v36, %v4504_v36 }
 0x954   : > { %v2347_v2 = vsel %vm750_vm3, %v2337_v16, -inf }
 0x955   : > { %2348 = vmax.xlane.f32.xlu0 %v2347_v2 }
 0x9c1   : > { %v2086_v4 = vpop.f32.mrb[40].mxu0 }
 0x9c2   : > { %v2324_v18 = vmul.f32 0.35355338, %v2086_v4  ;;  %v3730_v19 = vpop.f32.mrb[41].mxu0 }
 0x9c3   : > { %v2089_v21 = vpop.f32.mrb[42].mxu0  ;;  %v2132_v22 = vpop.f32.mrb[48].mxu1 }
 0x9c4   : > { %v2325_v24 = vmul.f32 0.35355338, %v2132_v22  ;;  %v3731_v28 = vpop.f32.mrb[43].mxu0  ;;  %v3736_v29 = vpop.f32.mrb[49].mxu1  ;;  %v4587_v32 = vsel %vm2334_vm9, %v2324_v18, -1e+09 }
 0x9c5   : > { %v2135_v33 = vpop.f32.mrb[50].mxu1  ;;  %v2350_v35 = vsel %vm750_vm3, %v4587_v32, -inf }
 0x9c6   : > { %2351 = vmax.xlane.f32.xlu0 %v2350_v35  ;;  %v3737_v37 = vpop.f32.mrb[51].mxu1  ;;  %v2339_v39 = vsel %vm2335_vm10, %v2325_v24, -1e+09 }
 0x9c7   : > { %v2353_v40 = vsel %vm750_vm3, %v2339_v39, -inf }
 0x9c8   : > { %2354 = vmax.xlane.f32.xlu1 %v2353_v40 }
 0x9c9   : > { %v2178_v41 = vpop.f32.mrb[44].mxu0 }
 0x9ca   : > { %v2326_v30 = vmul.f32 0.35355338, %v2178_v41  ;;  %v3742_v11 = vpop.f32.mrb[45].mxu0 }
 0x9cb   : > { %v2181_v38 = vpop.f32.mrb[46].mxu0  ;;  %v2224_v44 = vpop.f32.mrb[52].mxu1 }
 0x9cc   : > { %v2327_v45 = vmul.f32 0.35355338, %v2224_v44  ;;  %v3743_v46 = vpop.f32.mrb[47].mxu0  ;;  %v3748_v47 = vpop.f32.mrb[53].mxu1  ;;  %v4595_v5 = vsel %vm2334_vm9, %v2326_v30, -1e+09 }
 0x9cd   : > { %v2227_v48 = vpop.f32.mrb[54].mxu1  ;;  %v2356_v50 = vsel %vm750_vm3, %v4595_v5, -inf }
 0x9ce   : > { %2357 = vmax.xlane.f32.xlu0 %v2356_v50  ;;  %v3749_v51 = vpop.f32.mrb[55].mxu1  ;;  %v2341_v52 = vsel %vm2335_vm10, %v2327_v45, -1e+09  ;;  %v3455_v48 = vcombine.low %v4532_v43, %v4532_v43 }
 0x9cf   : > { %v2359_v53 = vsel %vm750_vm3, %v2341_v52, -inf }
 0x9d0   : > { %2360 = vmax.xlane.f32.xlu1 %v2359_v53  ;;  %v3457_v53 = vcombine.low %v4546_v6, %v4546_v6 }
 0x9d1   : > { %v2270_v56 = vpop.f32.mrb[48].mxu0 }
 0x9d2   : > { %v2328_v57 = vmul.f32 0.35355338, %v2270_v56  ;;  %v3754_v58 = vpop.f32.mrb[49].mxu0 }
 0x9d3   : > { %v2273_v59 = vpop.f32.mrb[50].mxu0  ;;  %v2316_v60 = vpop.f32.mrb[56].mxu1 }
 0x9d4   : > { %v2329_v61 = vmul.f32 0.35355338, %v2316_v60  ;;  %v3755_v34 = vpop.f32.mrb[51].mxu0  ;;  %v3760_v63 = vpop.f32.mrb[57].mxu1  ;;  %v4603_v1 = vsel %vm2334_vm9, %v2328_v57, -1e+09 }
 0x9d5   : > { %v2319_v7 = vpop.f32.mrb[58].mxu1  ;;  %v2362_v8 = vsel %vm750_vm3, %v4603_v1, -inf }
 0x9d6   : > { %2363 = vmax.xlane.f32.xlu0 %v2362_v8  ;;  %v3761_v54 = vpop.f32.mrb[59].mxu1  ;;  %v2343_v31 = vsel %vm2335_vm10, %v2329_v61, -1e+09 }
 0x9d7   : > { %v2365_v12 = vsel %vm750_vm3, %v2343_v31, -inf }
 0x9d8   : > { %2366 = vmax.xlane.f32.xlu1 %v2365_v12 }
 0x9e0   : > { %v2346_v15 = vpop.xlane.xlu1 %2345 }
 0x9e1   : > { %v2368_v2 = vsub.f32 %v4579_v27, %v2346_v15  ;;  %v3459_v15 = vcombine.low %v4551_v49, %v4551_v49 }
 0x9e2   : > { %v2349_v20 = vpop.xlane.xlu0 %2348 }
 0x9e3   : > { %v2369_v4 = vsub.f32 %v2337_v16, %v2349_v20  ;;  %v2376_v55 = vmul.f32 1.442695, %v2368_v2 }
 0x9e5   : > { %v2378_v18 = vmul.f32 1.442695, %v2369_v4  ;;  %3962 = vpow2.f32 %v2376_v55 }
 0x9e7   : > { %3964 = vpow2.f32 %v2378_v18 }
 0x9e9   : > { %2538 = vrot.lane.b32.xlu1 %v3449_v10, %s4062_s28 }
 0x9ec   : > { %2588 = vrot.lane.b32.xlu0 %v3451_v62, %s4062_s28 }
 0x9ef   : > { %v3963_v19 = vpop.eup %3962 }
 0x9f0   : > { %v2392_v36 = vsel %vm750_vm3, %v3963_v19, 0.0 }
 0x9f1   : > { %v3965_v21 = vpop.eup %3964 }
 0x9f2   : > { %v2395_v22 = vsel %vm750_vm3, %v3965_v21, 0.0 }
 0xa0b   : > { %2393 = vadd.xlane.f32.xlu0 %v2392_v36 }
 0xa0d   : > { %2396 = vadd.xlane.f32.xlu1 %v2395_v22 }
 0xa1e   : > { %2638 = vrot.lane.b32.xlu1 %v3453_v42, %s4062_s28 }
 0xa53   : > { %v2352_v24 = vpop.xlane.xlu0 %2351 }
 0xa54   : > { %v2370_v27 = vsub.f32 %v4587_v32, %v2352_v24 }
 0xa55   : > { %v2355_v16 = vpop.xlane.xlu1 %2354 }
 0xa56   : > { %v2380_v28 = vmul.f32 1.442695, %v2370_v27  ;;  %v2371_v29 = vsub.f32 %v2339_v39, %v2355_v16 }
 0xa58   : > { %3966 = vpow2.f32 %v2380_v28  ;;  %v2382_v33 = vmul.f32 1.442695, %v2371_v29 }
 0xa5a   : > { %3968 = vpow2.f32 %v2382_v33 }
 0xa5b   : > { %v2358_v50 = vpop.xlane.xlu0 %2357 }
 0xa5c   : > { %v2372_v51 = vsub.f32 %v4595_v5, %v2358_v50 }
 0xa5d   : > { %v2361_v35 = vpop.xlane.xlu1 %2360 }
 0xa5e   : > { %v2373_v37 = vsub.f32 %v2341_v52, %v2361_v35  ;;  %v2384_v56 = vmul.f32 1.442695, %v2372_v51 }
 0xa60   : > { %v2386_v40 = vmul.f32 1.442695, %v2373_v37 }
 0xa62   : > { %v4623_v41 = vpop.eup %3966  ;;  %3970 = vpow2.f32 %v2386_v40 }
 0xa63   : > { %v2398_v26 = vsel %vm750_vm3, %v4623_v41, 0.0  ;;  %v2364_v52 = vpop.xlane.xlu0 %2363 }
 0xa64   : > { %v4627_v30 = vpop.eup %3968  ;;  %2399 = vadd.xlane.f32.xlu0 %v2398_v26  ;;  %v2374_v57 = vsub.f32 %v4603_v1, %v2364_v52 }
 0xa65   : > { %v2367_v11 = vpop.xlane.xlu1 %2366  ;;  %v2401_v32 = vsel %vm750_vm3, %v4627_v30, 0.0 }
 0xa66   : > { %v2375_v39 = vsub.f32 %v2343_v31, %v2367_v11  ;;  %2402 = vadd.xlane.f32.xlu1 %v2401_v32  ;;  %v2388_v58 = vmul.f32 1.442695, %v2374_v57 }
 0xa67   : > { %v2589_v59 = vpop.permute.xlu0 %2588 }
 0xa68   : > { %v2390_v38 = vmul.f32 1.442695, %v2375_v39  ;;  %v2594_v62 = vsel %vm1268_vm4, %v2589_v59, 0 }
 0xa69   : > { %v2539_v43 = vpop.permute.xlu1 %2538 }
 0xa6a   : > { %3972 = vpow2.f32 %v2390_v38  ;;  %v2544_v12 = vsel %vm1268_vm4, %v2539_v43, 0 }
 0xa6b   : > { %3974 = vpow2.f32 %v2384_v56 }
 0xa6c   : > { %v4631_v44 = vpop.eup %3970  ;;  %3976 = vpow2.f32 %v2388_v58 }
 0xa6d   : > { %v2407_v45 = vsel %vm750_vm3, %v4631_v44, 0.0 }
 0xa6e   : > { %2408 = vadd.xlane.f32.xlu1 %v2407_v45 }
 0xa74   : > { %v4635_v46 = vpop.eup %3972 }
 0xa75   : > { %v2413_v47 = vsel %vm750_vm3, %v4635_v46, 0.0  ;;  %v4647_v60 = vpop.eup %3974 }
 0xa76   : > { %2414 = vadd.xlane.f32.xlu1 %v2413_v47  ;;  %v2404_v5 = vsel %vm750_vm3, %v4647_v60, 0.0  ;;  %v4651_v34 = vpop.eup %3976 }
 0xa77   : > { %v2410_v63 = vsel %vm750_vm3, %v4651_v34, 0.0 }
 0xa7a   : > { %2688 = vrot.lane.b32.xlu0 %v3455_v48, %s4062_s28 }
 0xa87   : > { %2738 = vrot.lane.b32.xlu1 %v3457_v53, %s4062_s28 }
 0xa98   : > { %v2394_v61 = vpop.xlane.xlu0 %2393 }
 0xa99   : > { %3978 = vrcp.f32 %v2394_v61  ;;  %2405 = vadd.xlane.f32.xlu0 %v2404_v5 }
 0xa9a   : > { %v2397_v6 = vpop.xlane.xlu1 %2396 }
 0xa9b   : > { %3980 = vrcp.f32 %v2397_v6 }
 0xa9d   : > { %2411 = vadd.xlane.f32.xlu0 %v2410_v63 }
 0xa9e   : > { %v2639_v20 = vpop.permute.xlu1 %2638 }
 0xa9f   : > { %v2644_v24 = vsel %vm1268_vm4, %v2639_v20, 0 }
 0xaa3   : > { %v3979_v1 = vpop.eup %3978 }
 0xaa4   : > { %v2424_v7 = vmul.f32 %v3979_v1, %v3963_v19 }
 0xaa5   : > { %v3981_v8 = vpop.eup %3980 }
 0xaa6   : > { %v2425_v54 = vmul.f32 %v3981_v8, %v3965_v21  ;;  %v2432_v31 = vpack.c.bf16 %v2424_v7, %v2424_v7 }
 0xaa8   : > { %3765 = vmatmul.mubr.msk.bf16.vlgmr.msra.gmra.mrb[52].mxu0 %vm750_vm3, %v2432_v31  ;;  %v2433_v10 = vpack.c.bf16 %v2425_v54, %v2425_v54 }
 0xaa9   : > { %3775 = vmatpush3.bf16.msra.mxu0 %v2544_v12  ;;  %3776 = vmatprep.mubr.msk.bf16.mxu0 %vm4058_vm1, %v4057_v3 }
 0xaaa   : > { %3771 = vmatmul.mubr.msk.bf16.vlgmr.msra.gmra.mrb[60].mxu1 %vm750_vm3, %v2433_v10  ;;  %3786 = vmatprep.subr.bf16.mxu0 %v4057_v3  ;;  %v3918_v10 = vld [vmem:[%s4178_s29] sm:$0xff]  }
 0xaab   : > { %3781 = vmatpush3.bf16.msra.mxu1 %v2594_v62  ;;  %3782 = vmatprep.mubr.msk.bf16.mxu1 %vm4058_vm1, %v4057_v3 }
 0xaac   : > { %3792 = vmatprep.subr.bf16.mxu1 %v4057_v3 }
 0xab3   : > { %2788 = vrot.lane.b32.xlu0 %v3459_v15, %s4062_s28 }
 0xaf1   : > { %v2400_v2 = vpop.xlane.xlu0 %2399 }
 0xaf2   : > { %3982 = vrcp.f32 %v2400_v2 }
 0xaf3   : > { %v2403_v4 = vpop.xlane.xlu1 %2402 }
 0xaf4   : > { %3984 = vrcp.f32 %v2403_v4 }
 0xaf5   : > { %v2689_v42 = vpop.permute.xlu0 %2688 }
 0xaf6   : > { %v2694_v27 = vsel %vm1268_vm4, %v2689_v42, 0 }
 0xafb   : > { %v2409_v55 = vpop.xlane.xlu1 %2408 }
 0xafc   : > { %v3983_v18 = vpop.eup %3982  ;;  %3986 = vrcp.f32 %v2409_v55  ;;  %v3919_v55 = vld [vmem:[%s4178_s29 + $0x8] sm:$0xff]  }
 0xafd   : > { %v2426_v19 = vmul.f32 %v3983_v18, %v4623_v41 }
 0xafe   : > { %v3985_v21 = vpop.eup %3984 }
 0xaff   : > { %v2427_v36 = vmul.f32 %v3985_v21, %v4627_v30  ;;  %v2434_v22 = vpack.c.bf16 %v2426_v19, %v2426_v19 }
 0xb01   : > { %3777 = vmatmul.mubr.msk.bf16.vlgmr.msra.gmra.mrb[56].mxu0 %vm750_vm3, %v2434_v22  ;;  %v2435_v49 = vpack.c.bf16 %v2427_v36, %v2427_v36 }
 0xb02   : > { %3787 = vmatpush3.bf16.msra.mxu0 %v2644_v24  ;;  %3788 = vmatprep.mubr.msk.bf16.mxu0 %vm4058_vm1, %v4057_v3 }
 0xb03   : > { %3783 = vmatmul.mubr.msk.bf16.vlgmr.msra.gmra.mrb[64].mxu1 %vm750_vm3, %v2435_v49  ;;  %3798 = vmatprep.subr.bf16.mxu0 %v4057_v3  ;;  %v2415_v33 = vpop.xlane.xlu1 %2414 }
 0xb04   : > { %3793 = vmatpush3.bf16.msra.mxu1 %v2694_v27  ;;  %3794 = vmatprep.mubr.msk.bf16.mxu1 %vm4058_vm1, %v4057_v3  ;;  %3988 = vrcp.f32 %v2415_v33 }
 0xb05   : > { %3804 = vmatprep.subr.bf16.mxu1 %v4057_v3 }
 0xb06   : > { %v3987_v16 = vpop.eup %3986 }
 0xb07   : > { %v2429_v28 = vmul.f32 %v3987_v16, %v4631_v44  ;;  %v2739_v38 = vpop.permute.xlu1 %2738 }
 0xb09   : > { %v2437_v29 = vpack.c.bf16 %v2429_v28, %v2429_v28 }
 0xb0b   : > { %3795 = vmatmul.mubr.msk.bf16.vlgmr.msra.gmra.mrb[68].mxu1 %vm750_vm3, %v2437_v29 }
 0xb0c   : > { %3806 = vmatprep.mubr.msk.bf16.mxu1 %vm4058_vm1, %v4057_v3 }
 0xb0e   : > { %v3989_v37 = vpop.eup %3988 }
 0xb0f   : > { %v2431_v41 = vmul.f32 %v3989_v37, %v4635_v46  ;;  %v2744_v46 = vsel %vm1268_vm4, %v2739_v38, 0 }
 0xb11   : > { %v2439_v32 = vpack.c.bf16 %v2431_v41, %v2431_v41 }
 0xb26   : > { %v2406_v35 = vpop.xlane.xlu0 %2405 }
 0xb27   : > { %3990 = vrcp.f32 %v2406_v35 }
 0xb2a   : > { %v2412_v40 = vpop.xlane.xlu0 %2411 }
 0xb2b   : > { %3992 = vrcp.f32 %v2412_v40 }
 0xb2e   : > { %v2789_v26 = vpop.permute.xlu0 %2788 }
 0xb2f   : > { %v2794_v30 = vsel %vm1268_vm4, %v2789_v26, 0 }
 0xb30   : > { %3805 = vmatpush3.bf16.msra.mxu1 %v2794_v30 }
 0xb31   : > { %v3991_v11 = vpop.eup %3990  ;;  %3818 = vmatprep.subr.bf16.mxu1 %v4057_v3 }
 0xb32   : > { %v2428_v39 = vmul.f32 %v3991_v11, %v4647_v60 }
 0xb33   : > { %3807 = vmatmul.mubr.msk.bf16.vlgmr.msra.gmra.mrb[72].mxu1 %vm750_vm3, %v2439_v32 }
 0xb34   : > { %v2436_v44 = vpack.c.bf16 %v2428_v39, %v2428_v39  ;;  %3822 = vmatprep.mubr.msk.bf16.mxu1 %vm4058_vm1, %v4057_v3 }
 0xb35   : > { %v3993_v45 = vpop.eup %3992 }
 0xb36   : > { %3789 = vmatmul.mubr.msk.bf16.vlgmr.msra.gmra.mrb[60].mxu0 %vm750_vm3, %v2436_v44  ;;  %v2430_v47 = vmul.f32 %v3993_v45, %v4651_v34 }
 0xb37   : > { %3799 = vmatpush3.bf16.msra.mxu0 %v2744_v46  ;;  %3800 = vmatprep.mubr.msk.bf16.mxu0 %vm4058_vm1, %v4057_v3  ;;  %v2873_v46 = vsub.s32 4, %v4219_v9 }
 0xb38   : > { %3810 = vmatprep.subr.bf16.mxu0 %v4057_v3  ;;  %v2438_v48 = vpack.c.bf16 %v2430_v47, %v2430_v47  ;;  %v4718_v47 = vld [vmem:[%s4193_s24] sm:$0xff] }
 0xb3e   : > { %3801 = vmatmul.mubr.msk.bf16.vlgmr.msra.gmra.mrb[64].mxu0 %vm750_vm3, %v2438_v48  ;;  %v2874_v48 = vrot.slane %v4718_v47, %v2873_v46 }
 0xb3f   : > { %3814 = vmatprep.mubr.msk.bf16.mxu0 %vm4058_vm1, %v4057_v3  ;;  %3811 = vmatpush3.bf16.msra.mxu0 %v3918_v10  ;;  %v3923_v10 = vld [vmem:[%s4188_s17 + $0x8] sm:$0xff]  }
 0xb40   : > { %3812 = vmatprep.subr.bf16.mxu0 %v4057_v3 }
 0xb43   : > { %3813 = vmatpush3.bf16.msra.mxu0 %v3919_v55 }
 0xb44   : > { %3826 = vmatprep.subr.bf16.mxu0 %v4057_v3 }
 0xb7b   : > { %v2482_v50 = vpop.f32.mrb[52].mxu0 }
 0xb7c   : > { %v3766_v51 = vpop.f32.mrb[53].mxu0 }
 0xb7d   : > { %v2485_v52 = vpop.f32.mrb[54].mxu0  ;;  %v2530_v53 = vpop.f32.mrb[60].mxu1 }
 0xb7e   : > { %v3767_v56 = vpop.f32.mrb[55].mxu0  ;;  %v3772_v57 = vpop.f32.mrb[61].mxu1 }
 0xb7f   : > { %v2533_v58 = vpop.f32.mrb[62].mxu1 }
 0xb80   : > { %v3773_v59 = vpop.f32.mrb[63].mxu1 }
 0xbd4   : > { %v2580_v60 = vpop.f32.mrb[56].mxu0 }
 0xbd5   : > { %v3778_v43 = vpop.f32.mrb[57].mxu0 }
 0xbd6   : > { %v2583_v61 = vpop.f32.mrb[58].mxu0  ;;  %v2630_v5 = vpop.f32.mrb[64].mxu1 }
 0xbd7   : > { %v3895_v34 = vpack.i.bf16 %v2630_v5, %v2580_v60  ;;  %v3779_v6 = vpop.f32.mrb[59].mxu0  ;;  %v3784_v63 = vpop.f32.mrb[65].mxu1 }
 0xbd8   : > { %v2633_v1 = vpop.f32.mrb[66].mxu1 }
 0xbd9   : > { %3896 = vrot.lane.b32.xlu1 %v3895_v34, %s4064_s18  ;;  %v3785_v7 = vpop.f32.mrb[67].mxu1 }
 0xbde   : > { %v2730_v8 = vpop.f32.mrb[68].mxu1 }
 0xbdf   : > { %v3796_v54 = vpop.f32.mrb[69].mxu1 }
 0xbe0   : > { %v2733_v31 = vpop.f32.mrb[70].mxu1  ;;  %v3920_v54 = vld [vmem:[%s4183_s14] sm:$0xff]  }
 0xbe1   : > { %v3797_v12 = vpop.f32.mrb[71].mxu1  ;;  %3819 = vmatpush3.bf16.msra.mxu1 %v3920_v54  ;;  %v3921_v31 = vld [vmem:[%s4183_s14 + $0x8] sm:$0xff]  }
 0xbe2   : > { %3820 = vmatprep.subr.bf16.mxu1 %v4057_v3  ;;  %v3922_v12 = vld [vmem:[%s4188_s17] sm:$0xff]  }
 0xbe5   : > { %3821 = vmatpush3.bf16.msra.mxu1 %v3921_v31 }
 0xc06   : > { %v2830_v62 = vpop.f32.mrb[72].mxu1 }
 0xc07   : > { %v3808_v15 = vpop.f32.mrb[73].mxu1 }
 0xc08   : > { %v2833_v20 = vpop.f32.mrb[74].mxu1 }
 0xc09   : > { %v2680_v2 = vpop.f32.mrb[60].mxu0  ;;  %v3809_v4 = vpop.f32.mrb[75].mxu1 }
 0xc0a   : > { %v3900_v18 = vpack.i.bf16 %v2730_v8, %v2680_v2  ;;  %v3790_v19 = vpop.f32.mrb[61].mxu0 }
 0xc0b   : > { %v2683_v21 = vpop.f32.mrb[62].mxu0  ;;  %v2962_v19 = vrot.slane %v4474_v0, %v1687_v25  ;;  %v2978_v25 = vsub.s32 5, %v4219_v9 }
 0xc0c   : > { %v3791_v36 = vpop.f32.mrb[63].mxu0  ;;  %3901 = vrot.lane.b32.xlu0 %v3900_v18, %s4065_s22 }
 0xc11   : > { %v2780_v22 = vpop.f32.mrb[64].mxu0 }
 0xc12   : > { %v3905_v42 = vpack.i.bf16 %v2830_v62, %v2780_v22  ;;  %v3802_v24 = vpop.f32.mrb[65].mxu0  ;;  %v2968_v22 = vrot.slane %v4474_v0, %v1793_v17 }
 0xc13   : > { %v2783_v49 = vpop.f32.mrb[66].mxu0 }
 0xc14   : > { %v3803_v27 = vpop.f32.mrb[67].mxu0  ;;  %3906 = vrot.lane.b32.xlu1 %v3905_v42, %s4066_s16 }
 0xc4b   : > { %v3897_v16 = vpop.permute.xlu1 %3896 }
 0xc4c   : > { %v3899_v29 = vunpack.i.h.bf16 %v3897_v16  ;;  %v3898_v33 = vunpack.i.l.bf16 %v3897_v16 }
 0xc4e   : > { %v2861_v41 = vsel %vm750_vm3, %v2530_v53, %v3899_v29  ;;  %v2860_v26 = vsel %vm750_vm3, %v2482_v50, %v3898_v33  ;;  %v3924_v29 = vld [vmem:[%s4188_s17 + $0x10] sm:$0xff]   ;;  %v3925_v33 = vld [vmem:[%s4188_s17 + $0x18] sm:$0xff]  }
 0xc7e   : > { %v3902_v28 = vpop.permute.xlu0 %3901 }
 0xc7f   : > { %v3904_v35 = vunpack.i.h.bf16 %v3902_v28  ;;  %v3903_v37 = vunpack.i.l.bf16 %v3902_v28 }
 0xc81   : > { %v2863_v32 = vsel %vm1674_vm7, %v2861_v41, %v3904_v35  ;;  %v2862_v39 = vsel %vm1674_vm7, %v2860_v26, %v3903_v37  ;;  %v2979_v35 = vrot.slane %v4718_v47, %v2978_v25 }
 0xc86   : > { %v3907_v40 = vpop.permute.xlu1 %3906 }
 0xc87   : > { %v3909_v30 = vunpack.i.h.bf16 %v3907_v40  ;;  %v3908_v11 = vunpack.i.l.bf16 %v3907_v40 }
 0xc89   : > { %v2865_v38 = vsel %vm1677_vm8, %v2863_v32, %v3909_v30  ;;  %v2864_v44 = vsel %vm1677_vm8, %v2862_v39, %v3908_v11 }
 0xc8a   : > { %v2866_v45 = vpack.c.bf16 %v2865_v38, %v2864_v44  ;;  %v3049_v38 = vsub.s32 6, %v4219_v9 }
 0xc8c   : > { %3815 = vmatmul.mubr.msk.bf16.vlgmr.msra.gmra.mrb[68].mxu0 %vm683_vm2, %v2866_v45 }
 0xc8d   : > { %3834 = vmatprep.mubr.msk.bf16.mxu0 %vm4058_vm1, %v4057_v3  ;;  %3827 = vmatpush3.bf16.msra.mxu0 %v3922_v12  ;;  %v3151_v12 = vrot.slane %v4474_v0, %v1858_v14 }
 0xc8e   : > { %3828 = vmatprep.subr.bf16.mxu0 %v4057_v3 }
 0xc91   : > { %3829 = vmatpush3.bf16.msra.mxu0 %v3923_v10 }
 0xc92   : > { %3830 = vmatprep.subr.bf16.mxu0 %v4057_v3 }
 0xc95   : > { %3831 = vmatpush3.bf16.msra.mxu0 %v3924_v29 }
 0xc96   : > { %3832 = vmatprep.subr.bf16.mxu0 %v4057_v3  ;;  %v3050_v3 = vrot.slane %v4718_v47, %v3049_v38 }
 0xc99   : > { %3833 = vmatpush3.bf16.msra.mxu0 %v3925_v33 }
 0xd5f   : > { %v2924_v50 = vpop.f32.mrb[68].mxu0 }
 0xd60   : > { %v2925_v51 = vadd.f32 %v2924_v50, %v2874_v48  ;;  %v3816_v52 = vpop.f32.mrb[69].mxu0 }
 0xd61   : > { %v2927_v53 = vpop.f32.mrb[70].mxu0 }
 0xd62   : > { %v2928_v56 = vadd.f32 %v2927_v53, %v2874_v48  ;;  %v3817_v57 = vpop.f32.mrb[71].mxu0  ;;  %v2931_v58 = vadd.f32 %v2925_v51, %v4479_v13 }
 0xd64   : > { %v2933_v59 = vsel %vm683_vm2, %v2931_v58, 0.0  ;;  %v2932_v60 = vadd.f32 %v2928_v56, %v4481_v23 }
 0xd65   : > { %2934 = vadd.xlane.f32.xlu0 %v2933_v59 }
 0xd66   : > { %v2936_v43 = vsel %vm683_vm2, %v2932_v60, 0.0 }
 0xd67   : > { %2937 = vadd.xlane.f32.xlu1 %v2936_v43 }
 0xdf2   : > { %v2935_v61 = vpop.xlane.xlu0 %2934 }
 0xdf3   : > { %v2939_v5 = vmul.f32 0.03125, %v2935_v61 }
 0xdf4   : > { %v2938_v34 = vpop.xlane.xlu1 %2937 }
 0xdf5   : > { %v2941_v6 = vsub.f32 %v2931_v58, %v2939_v5  ;;  %v2940_v63 = vmul.f32 0.03125, %v2938_v34 }
 0xdf7   : > { %v2942_v1 = vsub.f32 %v2932_v60, %v2940_v63  ;;  %v2943_v7 = vmul.f32 %v2941_v6, %v2941_v6 }
 0xdf9   : > { %v2945_v13 = vsel %vm683_vm2, %v2943_v7, 0.0  ;;  %v2944_v8 = vmul.f32 %v2942_v1, %v2942_v1 }
 0xdfa   : > { %2946 = vadd.xlane.f32.xlu0 %v2945_v13 }
 0xdfb   : > { %v2948_v23 = vsel %vm683_vm2, %v2944_v8, 0.0 }
 0xdfe   : > { %2949 = vadd.xlane.f32.xlu0 %v2948_v23 }
 0xe87   : > { %v2947_v62 = vpop.xlane.xlu0 %2946 }
 0xe88   : > { %v2951_v15 = vmul.f32 0.03125, %v2947_v62  ;;  %v3157_v62 = vrot.slane %v4474_v0, %v2873_v46 }
 0xe8a   : > { %v2953_v20 = vadd.f32 1e-06, %v2951_v15 }
 0xe8b   : > { %v2950_v2 = vpop.xlane.xlu0 %2949 }
 0xe8c   : > { %3994 = vrsqrt.f32 %v2953_v20  ;;  %v2952_v4 = vmul.f32 0.03125, %v2950_v2 }
 0xe8e   : > { %v2954_v55 = vadd.f32 1e-06, %v2952_v4 }
 0xe90   : > { %3996 = vrsqrt.f32 %v2954_v55 }
 0xe96   : > { %v3995_v18 = vpop.eup %3994 }
 0xe97   : > { %v2957_v21 = vmul.f32 %v3995_v18, %v2941_v6 }
 0xe99   : > { %v2963_v42 = vmul.f32 %v2962_v19, %v2957_v21 }
 0xe9a   : > { %v3997_v36 = vpop.eup %3996 }
 0xe9b   : > { %v2958_v24 = vmul.f32 %v3997_v36, %v2942_v1  ;;  %v2969_v27 = vadd.f32 %v2968_v22, %v2963_v42 }
 0xe9d   : > { %v2964_v49 = vmul.f32 %v2962_v19, %v2958_v24 }
 0xe9f   : > { %v2970_v16 = vadd.f32 %v2968_v22, %v2964_v49 }
 0xea1   : > { %v2971_v28 = vpack.c.bf16 %v2970_v16, %v2969_v27 }
 0xea3   : > { %3823 = vmatmul.mubr.msk.bf16.vlgmr.msra.gmra.mrb[76].mxu1 %vm683_vm2, %v2971_v28 }
 0xf76   : > { %v3029_v37 = vpop.f32.mrb[76].mxu1 }
 0xf77   : > { %v3030_v17 = vadd.f32 %v3029_v37, %v2979_v35  ;;  %v3824_v40 = vpop.f32.mrb[77].mxu1 }
 0xf78   : > { %v3032_v41 = vpop.f32.mrb[78].mxu1 }
 0xf79   : > { %v3033_v26 = vadd.f32 %v3032_v41, %v2979_v35  ;;  %v3825_v30 = vpop.f32.mrb[79].mxu1  ;;  %v3036_v11 = vmax.f32 %v3030_v17, 0.0 }
 0xf7b   : > { %v3037_v32 = vmax.f32 %v3033_v26, 0.0 }
 0xf7d   : > { %v3038_v39 = vpack.c.bf16 %v3037_v32, %v3036_v11 }
 0xf7f   : > { %3835 = vmatmul.mubr.msk.bf16.vlgmr.msra.gmra.mrb[72].mxu0 %vm3075_vm11, %v3038_v39 }
0x1052   : > { %v3113_v44 = vpop.f32.mrb[72].mxu0 }
0x1053   : > { %v3114_v45 = vadd.f32 %v3113_v44, %v3050_v3  ;;  %v3836_v48 = vpop.f32.mrb[73].mxu0 }
0x1054   : > { %v3116_v50 = vpop.f32.mrb[74].mxu0 }
0x1055   : > { %v3117_v51 = vadd.f32 %v3116_v50, %v3050_v3  ;;  %v3837_v52 = vpop.f32.mrb[75].mxu0  ;;  %v3120_v53 = vadd.f32 %v3114_v45, %v2969_v27 }
0x1057   : > { %v3122_v56 = vsel %vm683_vm2, %v3120_v53, 0.0  ;;  %v3121_v57 = vadd.f32 %v3117_v51, %v2970_v16 }
0x1058   : > { %3123 = vadd.xlane.f32.xlu1 %v3122_v56 }
0x1059   : > { %v3125_v58 = vsel %vm683_vm2, %v3121_v57, 0.0 }
0x105a   : > { %3126 = vadd.xlane.f32.xlu0 %v3125_v58 }
0x10e5   : > { %v3124_v59 = vpop.xlane.xlu1 %3123 }
0x10e6   : > { %v3128_v60 = vmul.f32 0.03125, %v3124_v59 }
0x10e7   : > { %v3127_v43 = vpop.xlane.xlu0 %3126 }
0x10e8   : > { %v3130_v61 = vsub.f32 %v3120_v53, %v3128_v60  ;;  %v3129_v5 = vmul.f32 0.03125, %v3127_v43 }
0x10ea   : > { %v3131_v47 = vsub.f32 %v3121_v57, %v3129_v5  ;;  %v3132_v34 = vmul.f32 %v3130_v61, %v3130_v61 }
0x10ec   : > { %v3134_v6 = vsel %vm683_vm2, %v3132_v34, 0.0  ;;  %v3133_v63 = vmul.f32 %v3131_v47, %v3131_v47 }
0x10ed   : > { %3135 = vadd.xlane.f32.xlu1 %v3134_v6 }
0x10ee   : > { %v3137_v1 = vsel %vm683_vm2, %v3133_v63, 0.0 }
0x10ef   : > { %3138 = vadd.xlane.f32.xlu0 %v3137_v1 }
0x117a   : > { %v3136_v7 = vpop.xlane.xlu1 %3135 }
0x117b   : > { %v3140_v13 = vmul.f32 0.03125, %v3136_v7 }
0x117c   : > { %v3139_v8 = vpop.xlane.xlu0 %3138 }
0x117d   : > { %v3142_v23 = vadd.f32 1e-06, %v3140_v13  ;;  %v3141_v54 = vmul.f32 0.03125, %v3139_v8 }
0x117f   : > { %3998 = vrsqrt.f32 %v3142_v23  ;;  %v3143_v31 = vadd.f32 1e-06, %v3141_v54 }
0x1181   : > { %4000 = vrsqrt.f32 %v3143_v31 }
0x1189   : > { %v3999_v10 = vpop.eup %3998 }
0x118a   : > { %v3146_v15 = vmul.f32 %v3999_v10, %v3130_v61 }
0x118b   : > { %v4001_v20 = vpop.eup %4000 }
0x118c   : > { %v3152_v2 = vmul.f32 %v3151_v12, %v3146_v15  ;;  %v3147_v4 = vmul.f32 %v4001_v20, %v3131_v47  ;;  %3165 = sbr.rel (%p3472_p6) target bundleno = 4499 (0x1193), region = 76 }
0x118e   : > { %v3158_v55 = vadd.f32 %v3157_v62, %v3152_v2  ;;  %v3153_v18 = vmul.f32 %v3151_v12, %v3147_v4 }
0x1190   : > { %3160 = vst.msk [vmem:[#allocation2] sm:$0xff] %vm683_vm2, %v3158_v55  ;;  %v3159_v19 = vadd.f32 %v3157_v62, %v3153_v18  ;;  %3166 = vst.msk [vmem:[#allocation3] sm:$0xff] (!%p3472_p6), %vm683_vm2, %v3158_v55 }
0x1192   : > { %3161 = vst.msk [vmem:[#allocation2 + $0x8] sm:$0xff] %vm683_vm2, %v3159_v19  ;;  %3167 = vst.msk [vmem:[#allocation3 + $0x8] sm:$0xff] (!%p3472_p6), %vm683_vm2, %v3159_v19 }
0x1193 PF: > { %s4825_s29 = sadd.s32 4294967295, %s4055_s23   ;;  %s4067_s17 = smov [#allocation3]  }
0x1194   : > { %p4767_p7 = scmp.eq.s32.totalorder %s4825_s29, 1  ;;  %s3177_s24 = sshll.u32 %s4067_s17, 4  ;;  %s3178_s24 = int_to_ptr.vmem [resolvable:$true] %s3177_s24 }
0x1195   : > { %s4003_s5 = scalar_lea.vmem %s3178_s24, 256  ;;  %p4010_p11 = scmp.lt.s32.totalorder %s3178_s24, %s3178_s24 }
0x1196   : > { %p4004_p8 = scmp.ne.s32.totalorder %s3178_s24, %s4003_s5  ;;  %p4011_p12 = scmp.lt.s32.totalorder %s4003_s5, %s4003_s5 }
0x1198   : > { %p4005_p9 = pnand %p4004_p8, %p4767_p7  ;;  %p4012_p13 = por %p4011_p12, %p4010_p11 }
0x119a   : > { %p4006_p10 = pneg %p4005_p9 }
0x119c   : > { %p4013_p0 = pnand %p4012_p13, %p4006_p10 }
0x119e   : > { %4016 = shalt.err (!%p4013_p0)
}
0x119f   : > { %s4017_s27 = scalar_lea.hbm %s4815_s12, 256 }
0x11a0   : > { %p4018_p1 = scmp.ne.s32.totalorder %s4815_s12, %s4017_s27  ;;  %p4023_p4 = scmp.lt.u32.totalorder %s4017_s27, %s4815_s12 }
0x11a2   : > { %p4019_p2 = pnand %p4018_p1, %p4767_p7 }
0x11a4   : > { %p4020_p3 = pneg %p4019_p2 }
0x11a6   : > { %p4025_p5 = pnand %p4023_p4, %p4020_p3 }
0x11a8   : > { %4028 = shalt.err (!%p4025_p5)
}
0x11a9   : > { %s4068_s16 = smov 128  }
0x11aa   : > { %3839 = dma.vmem_to_hbm [thread:$0]  (%p4767_p7), %s3178_s24, 256, %s4815_s12, [#allocation4], %s4068_s16, %s4068_s16, %s4064_s18  }
0x11ab   : > { %4042 = dma.done.wait (%p4767_p7), [#allocation4], 256  }
0x11ac   : > { %4044 = vsyncadd (%p4767_p7), [#allocation4], 4294967040 }
0x11ad PF: > { %s23_s23 = sadd.s32 1, %s4055_s23   ;;  %s4827_s21 = sld [smem:[#allocation6_spill]] }
0x11ae   : > { %p20_p6 = scmp.ge.s32.totalorder %s23_s23, 4   ;;  %s4828_s22 = sld [smem:[#allocation7_spill]] }
0x11b0   :  { %22 = sbr.rel (!%p20_p6) target bundleno = 6 (0x6), region = 137 }
0x11b7   :  { %3193 = vsyncpa [#allocation4], 1 }
0x11b8   :  { %3195 = vsyncpa [#allocation4 + $0x1], 1 }

</bundles_post_ra>
